<compile_context>
chip_gen: v5e
topology: v5e:2x2
jax: 0.10.0
libtpu: 0.0.40
codegen_flags: <defaults>
</compile_context>

<pallas_src>
import functools

import jax
import jax.numpy as jnp
from jax.experimental import pallas as pl
from jax.experimental.pallas import tpu as pltpu


def cbow_kernel(idx_ref, emb_ref, wf_ref, b1_ref, w2_ref, b2_ref, out_ref):
    tm, L = idx_ref.shape
    n_word = emb_ref.shape[0]

    idx = idx_ref[...]                                            # (TM, L) int32
    word_ids = jax.lax.broadcasted_iota(jnp.int32, (tm, n_word), 1)

    # Fused embedding gather + context sum:
    #   counts[b, w] = #{ j : x[b, j] == w }   ->   sum_j emb[x[b, j]] = counts @ E
    counts = (idx[:, 0:1] == word_ids).astype(jnp.float32)
    for j in range(1, L):                                         # L small, static unroll
        counts = counts + (idx[:, j:j + 1] == word_ids).astype(jnp.float32)

    s = jnp.dot(counts, emb_ref[...], preferred_element_type=jnp.float32)   # (TM, n_dim)

    # project + linear1 folded offline: h = relu(s @ (W1 @ Wp)^T + b1)
    h = jnp.dot(s, wf_ref[...], preferred_element_type=jnp.float32) + b1_ref[...]
    h = jnp.maximum(h, 0.0)                                       # (TM, hidden)

    logits = jnp.dot(h, w2_ref[...], preferred_element_type=jnp.float32) + b2_ref[...]

    # stable log_softmax over the vocab (lane) axis
    m = jnp.max(logits, axis=-1, keepdims=True)
    shifted = logits - m
    lse = jnp.log(jnp.sum(jnp.exp(shifted), axis=-1, keepdims=True))
    out_ref[...] = shifted - lse


def prepare_params(emb_table, w_proj, w1, b1, w2, b2):
    """One-time (offline) weight prep: fold project into linear1 and lay out
    every matrix as (in_features, out_features); biases as (1, out)."""
    w_fused = jnp.dot(w1, w_proj, precision=jax.lax.Precision.HIGHEST).T  # (n_dim, 128)
    w2_t = w2.T                                                           # (128, n_word)
    b1_r = b1.reshape(1, -1)
    b2_r = b2.reshape(1, -1)
    return emb_table, w_fused, b1_r, w2_t, b2_r


@functools.partial(jax.jit, static_argnames=("tm",))
def _cbow_pallas(x_idx, emb_table, w_fused, b1_r, w2_t, b2_r, *, tm):
    Bp, L = x_idx.shape
    n_word, n_dim = emb_table.shape
    hidden = w_fused.shape[1]

    full = lambda shape: pl.BlockSpec(shape, lambda i: (0, 0))

    return pl.pallas_call(
        cbow_kernel,
        out_shape=jax.ShapeDtypeStruct((Bp, n_word), jnp.float32),
        grid_spec=pltpu.PrefetchScalarGridSpec(
            num_scalar_prefetch=0,
            grid=(Bp // tm,),
            in_specs=[
                pl.BlockSpec((tm, L), lambda i: (i, 0)),   # word indices per block
                full((n_word, n_dim)),                     # embedding table (VMEM resident)
                full((n_dim, hidden)),                     # fused (W1 @ Wp)^T
                full((1, hidden)),                         # b1
                full((hidden, n_word)),                    # W2^T
                full((1, n_word)),                         # b2
            ],
            out_specs=pl.BlockSpec((tm, n_word), lambda i: (i, 0)),
        ),
        compiler_params=pltpu.CompilerParams(
            dimension_semantics=("parallel",)),
    )(x_idx, emb_table, w_fused, b1_r, w2_t, b2_r)


def cbow_forward_batched(x_idx, emb_table, w_fused, b1_r, w2_t, b2_r, *, max_tm=128):
    """x_idx: (B, L) int32 word indices -> (B, n_word) log-probs."""
    B, _ = x_idx.shape
    # Batch tile: round B up to a sublane multiple (8), cap at max_tm.
    tm = min(max_tm, ((B + 7) // 8) * 8)
    pad = (-B) % tm
    if pad:
        x_idx = jnp.pad(x_idx, ((0, pad), (0, 0)))
    out = _cbow_pallas(x_idx, emb_table, w_fused, b1_r, w2_t, b2_r, tm=tm)
    return out[:B] if pad else out


def cbow_forward(x_idx_1d, emb_table, w_fused, b1_r, w2_t, b2_r):
    """Exact module interface: x (L,) int32 -> (1, n_word) log-probs."""
    return cbow_forward_batched(x_idx_1d[None, :], emb_table, w_fused, b1_r, w2_t, b2_r)


def cbow_reference(x_idx, emb_table, w_proj, w1, b1, w2, b2):
    """Faithful (un-folded) re-statement of the PyTorch forward for one window."""
    emb = emb_table[x_idx]                          # (L, n_dim)
    p = emb @ w_proj.T
    s = jnp.sum(p, axis=0, keepdims=True)
    h = jax.nn.relu(s @ w1.T + b1)
    logits = h @ w2.T + b2
    return jax.nn.log_softmax(logits, axis=-1)      # (1, n_word)


if __name__ == "__main__":
    n_word, n_dim, context_size, hidden = 128, 32, 4, 128
    L = 2 * context_size          # 8 context words per window
    B = 256                       # windows per call (2 grid blocks of 128)

    key = jax.random.PRNGKey(0)
    k0, k1, k2, k3, k4, k5, k6 = jax.random.split(key, 7)

    emb_table = jax.random.normal(k0, (n_word, n_dim), jnp.float32) * 0.1
    w_proj = jax.random.normal(k1, (n_dim, n_dim), jnp.float32) * 0.1     # (out, in)
    w1 = jax.random.normal(k2, (hidden, n_dim), jnp.float32) * 0.1        # (out, in)
    b1 = jax.random.normal(k3, (hidden,), jnp.float32) * 0.1
    b2 = jax.random.normal(k5, (n_word,), jnp.float32) * 0.1
    w2 = jax.random.normal(k4, (n_word, hidden), jnp.float32) * 0.1       # (out, in)

    x_batch = jax.random.randint(k6, (B, L), 0, n_word, dtype=jnp.int32)

    # One-time weight preparation (outside the hot path).
    params = prepare_params(emb_table, w_proj, w1, b1, w2, b2)

    # Batched kernel.
    out = cbow_forward_batched(x_batch, *params)
    out = jax.block_until_ready(out)
    assert out.shape == (B, n_word)

    ref = jax.vmap(
        lambda xi: cbow_reference(xi, emb_table, w_proj, w1, b1, w2, b2)[0]
    )(x_batch)
    # Tolerance covers FP reassociation from folding W_proj into W1 and summing
    # the context before projecting (mathematically identical).
    assert jnp.allclose(out, ref, atol=2e-3, rtol=1e-3), "batched mismatch vs reference"

    # Single-window path (matches the PyTorch module signature exactly).
    out1 = cbow_forward(x_batch[0], *params)
    out1 = jax.block_until_ready(out1)
    assert out1.shape == (1, n_word)
    assert jnp.allclose(out1, ref[0:1], atol=2e-3, rtol=1e-3), "single-window mismatch"

    print("KERNEL_OK")
</pallas_src>

<mosaic_0001>
module attributes {stable_mosaic.version = 11 : i64} {
  func.func @cbow_kernel(%arg0: i32, %arg1: memref<128x8xi32, #tpu.memory_space<vmem>>, %arg2: memref<128x32xf32, #tpu.memory_space<vmem>>, %arg3: memref<32x128xf32, #tpu.memory_space<vmem>>, %arg4: memref<1x128xf32, #tpu.memory_space<vmem>>, %arg5: memref<128x128xf32, #tpu.memory_space<vmem>>, %arg6: memref<1x128xf32, #tpu.memory_space<vmem>>, %arg7: memref<128x128xf32, #tpu.memory_space<vmem>>) attributes {dimension_semantics = [#tpu.dimension_semantics<parallel>], iteration_bounds = array<i64: 2>, scalar_prefetch = 0 : i64, scratch_operands = 0 : i64, tpu.core_type = #tpu.core_type<tc>, window_params = [{transform_indices = @transform_0, window_bounds = array<i64: 128, 8>}, {pipeline_mode = #tpu.pipeline_mode<synchronous>, transform_indices = @transform_1, window_bounds = array<i64: 128, 32>}, {pipeline_mode = #tpu.pipeline_mode<synchronous>, transform_indices = @transform_2, window_bounds = array<i64: 32, 128>}, {pipeline_mode = #tpu.pipeline_mode<synchronous>, transform_indices = @transform_3, window_bounds = array<i64: 1, 128>}, {pipeline_mode = #tpu.pipeline_mode<synchronous>, transform_indices = @transform_4, window_bounds = array<i64: 128, 128>}, {pipeline_mode = #tpu.pipeline_mode<synchronous>, transform_indices = @transform_5, window_bounds = array<i64: 1, 128>}, {transform_indices = @transform_6, window_bounds = array<i64: 128, 128>}]} {
    %c0 = arith.constant 0 : index
    %c0_0 = arith.constant 0 : index
    %0 = vector.load %arg1[%c0, %c0_0] : memref<128x8xi32, #tpu.memory_space<vmem>>, vector<128x8xi32>
    %1 = tpu.iota {dimensions = array<i32: 1>} : vector<128x128xi32>
    %2 = vector.extract_strided_slice %0 {offsets = [0, 0], sizes = [128, 1], strides = [1, 1]} : vector<128x8xi32> to vector<128x1xi32>
    %3 = vector.broadcast %2 : vector<128x1xi32> to vector<128x128xi32>
    %4 = arith.cmpi eq, %3, %1 : vector<128x128xi32>
    %5 = arith.extui %4 : vector<128x128xi1> to vector<128x128xi32>
    %6 = arith.sitofp %5 : vector<128x128xi32> to vector<128x128xf32>
    %7 = vector.extract_strided_slice %0 {offsets = [0, 1], sizes = [128, 1], strides = [1, 1]} : vector<128x8xi32> to vector<128x1xi32>
    %8 = vector.broadcast %7 : vector<128x1xi32> to vector<128x128xi32>
    %9 = arith.cmpi eq, %8, %1 : vector<128x128xi32>
    %10 = arith.extui %9 : vector<128x128xi1> to vector<128x128xi32>
    %11 = arith.sitofp %10 : vector<128x128xi32> to vector<128x128xf32>
    %12 = arith.addf %6, %11 : vector<128x128xf32>
    %13 = vector.extract_strided_slice %0 {offsets = [0, 2], sizes = [128, 1], strides = [1, 1]} : vector<128x8xi32> to vector<128x1xi32>
    %14 = vector.broadcast %13 : vector<128x1xi32> to vector<128x128xi32>
    %15 = arith.cmpi eq, %14, %1 : vector<128x128xi32>
    %16 = arith.extui %15 : vector<128x128xi1> to vector<128x128xi32>
    %17 = arith.sitofp %16 : vector<128x128xi32> to vector<128x128xf32>
    %18 = arith.addf %12, %17 : vector<128x128xf32>
    %19 = vector.extract_strided_slice %0 {offsets = [0, 3], sizes = [128, 1], strides = [1, 1]} : vector<128x8xi32> to vector<128x1xi32>
    %20 = vector.broadcast %19 : vector<128x1xi32> to vector<128x128xi32>
    %21 = arith.cmpi eq, %20, %1 : vector<128x128xi32>
    %22 = arith.extui %21 : vector<128x128xi1> to vector<128x128xi32>
    %23 = arith.sitofp %22 : vector<128x128xi32> to vector<128x128xf32>
    %24 = arith.addf %18, %23 : vector<128x128xf32>
    %25 = vector.extract_strided_slice %0 {offsets = [0, 4], sizes = [128, 1], strides = [1, 1]} : vector<128x8xi32> to vector<128x1xi32>
    %26 = vector.broadcast %25 : vector<128x1xi32> to vector<128x128xi32>
    %27 = arith.cmpi eq, %26, %1 : vector<128x128xi32>
    %28 = arith.extui %27 : vector<128x128xi1> to vector<128x128xi32>
    %29 = arith.sitofp %28 : vector<128x128xi32> to vector<128x128xf32>
    %30 = arith.addf %24, %29 : vector<128x128xf32>
    %31 = vector.extract_strided_slice %0 {offsets = [0, 5], sizes = [128, 1], strides = [1, 1]} : vector<128x8xi32> to vector<128x1xi32>
    %32 = vector.broadcast %31 : vector<128x1xi32> to vector<128x128xi32>
    %33 = arith.cmpi eq, %32, %1 : vector<128x128xi32>
    %34 = arith.extui %33 : vector<128x128xi1> to vector<128x128xi32>
    %35 = arith.sitofp %34 : vector<128x128xi32> to vector<128x128xf32>
    %36 = arith.addf %30, %35 : vector<128x128xf32>
    %37 = vector.extract_strided_slice %0 {offsets = [0, 6], sizes = [128, 1], strides = [1, 1]} : vector<128x8xi32> to vector<128x1xi32>
    %38 = vector.broadcast %37 : vector<128x1xi32> to vector<128x128xi32>
    %39 = arith.cmpi eq, %38, %1 : vector<128x128xi32>
    %40 = arith.extui %39 : vector<128x128xi1> to vector<128x128xi32>
    %41 = arith.sitofp %40 : vector<128x128xi32> to vector<128x128xf32>
    %42 = arith.addf %36, %41 : vector<128x128xf32>
    %43 = vector.extract_strided_slice %0 {offsets = [0, 7], sizes = [128, 1], strides = [1, 1]} : vector<128x8xi32> to vector<128x1xi32>
    %44 = vector.broadcast %43 : vector<128x1xi32> to vector<128x128xi32>
    %45 = arith.cmpi eq, %44, %1 : vector<128x128xi32>
    %46 = arith.extui %45 : vector<128x128xi1> to vector<128x128xi32>
    %47 = arith.sitofp %46 : vector<128x128xi32> to vector<128x128xf32>
    %48 = arith.addf %42, %47 : vector<128x128xf32>
    %c0_1 = arith.constant 0 : index
    %c0_2 = arith.constant 0 : index
    %49 = vector.load %arg2[%c0_1, %c0_2] : memref<128x32xf32, #tpu.memory_space<vmem>>, vector<128x32xf32>
    %cst = arith.constant dense<0.000000e+00> : vector<128x32xf32>
    %50 = tpu.matmul %48, %49, %cst {dimension_numbers = #tpu.dot_dimension_numbers<[1], [0], [0], [1], [0, 0, 1, 1], [], []>} : vector<128x128xf32>, vector<128x32xf32>, vector<128x32xf32> -> vector<128x32xf32>
    %c0_3 = arith.constant 0 : index
    %c0_4 = arith.constant 0 : index
    %51 = vector.load %arg3[%c0_3, %c0_4] : memref<32x128xf32, #tpu.memory_space<vmem>>, vector<32x128xf32>
    %cst_5 = arith.constant dense<0.000000e+00> : vector<128x128xf32>
    %52 = tpu.matmul %50, %51, %cst_5 {dimension_numbers = #tpu.dot_dimension_numbers<[1], [0], [0], [1], [0, 0, 1, 1], [], []>} : vector<128x32xf32>, vector<32x128xf32>, vector<128x128xf32> -> vector<128x128xf32>
    %c0_6 = arith.constant 0 : index
    %c0_7 = arith.constant 0 : index
    %53 = vector.load %arg4[%c0_6, %c0_7] : memref<1x128xf32, #tpu.memory_space<vmem>>, vector<1x128xf32>
    %54 = vector.broadcast %53 : vector<1x128xf32> to vector<128x128xf32>
    %55 = arith.addf %52, %54 : vector<128x128xf32>
    %cst_8 = arith.constant 0.000000e+00 : f32
    %56 = vector.broadcast %cst_8 : f32 to vector<128x128xf32>
    %57 = arith.maximumf %55, %56 : vector<128x128xf32>
    %c0_9 = arith.constant 0 : index
    %c0_10 = arith.constant 0 : index
    %58 = vector.load %arg5[%c0_9, %c0_10] : memref<128x128xf32, #tpu.memory_space<vmem>>, vector<128x128xf32>
    %cst_11 = arith.constant dense<0.000000e+00> : vector<128x128xf32>
    %59 = tpu.matmul %57, %58, %cst_11 {dimension_numbers = #tpu.dot_dimension_numbers<[1], [0], [0], [1], [0, 0, 1, 1], [], []>} : vector<128x128xf32>, vector<128x128xf32>, vector<128x128xf32> -> vector<128x128xf32>
    %c0_12 = arith.constant 0 : index
    %c0_13 = arith.constant 0 : index
    %60 = vector.load %arg6[%c0_12, %c0_13] : memref<1x128xf32, #tpu.memory_space<vmem>>, vector<1x128xf32>
    %61 = vector.broadcast %60 : vector<1x128xf32> to vector<128x128xf32>
    %62 = arith.addf %59, %61 : vector<128x128xf32>
    %cst_14 = arith.constant dense<0xFF800000> : vector<128xf32>
    %63 = vector.multi_reduction <maximumf>, %62, %cst_14 [1] : vector<128x128xf32> to vector<128xf32>
    %64 = vector.shape_cast %63 : vector<128xf32> to vector<128x1xf32>
    %65 = vector.broadcast %64 : vector<128x1xf32> to vector<128x128xf32>
    %66 = arith.subf %62, %65 : vector<128x128xf32>
    %67 = math.exp %66 : vector<128x128xf32>
    %cst_15 = arith.constant dense<0.000000e+00> : vector<128xf32>
    %68 = vector.multi_reduction <add>, %67, %cst_15 [1] : vector<128x128xf32> to vector<128xf32>
    %69 = vector.shape_cast %68 : vector<128xf32> to vector<128x1xf32>
    %70 = math.log %69 : vector<128x1xf32>
    %71 = vector.broadcast %70 : vector<128x1xf32> to vector<128x128xf32>
    %72 = arith.subf %66, %71 : vector<128x128xf32>
    %c0_16 = arith.constant 0 : index
    %c0_17 = arith.constant 0 : index
    %73 = vector.load %arg7[%c0_16, %c0_17] : memref<128x128xf32, #tpu.memory_space<vmem>>, vector<128x128xf32>
    tpu.vector_store %arg7[%c0_16, %c0_17], %72 {strides = array<i32>} : memref<128x128xf32, #tpu.memory_space<vmem>>, vector<128x128xf32>,
    return
  }
  func.func @transform_0(%arg0: i32) -> (i32, i32) {
    %c0_i32 = arith.constant 0 : i32
    %c0_i32_0 = arith.constant 0 : i32
    return %arg0, %c0_i32 : i32, i32
  }
  func.func @transform_1(%arg0: i32) -> (i32, i32) {
    %c0_i32 = arith.constant 0 : i32
    %c0_i32_0 = arith.constant 0 : i32
    %c0_i32_1 = arith.constant 0 : i32
    return %c0_i32, %c0_i32_0 : i32, i32
  }
  func.func @transform_2(%arg0: i32) -> (i32, i32) {
    %c0_i32 = arith.constant 0 : i32
    %c0_i32_0 = arith.constant 0 : i32
    %c0_i32_1 = arith.constant 0 : i32
    return %c0_i32, %c0_i32_0 : i32, i32
  }
  func.func @transform_3(%arg0: i32) -> (i32, i32) {
    %c0_i32 = arith.constant 0 : i32
    %c0_i32_0 = arith.constant 0 : i32
    %c0_i32_1 = arith.constant 0 : i32
    return %c0_i32, %c0_i32_0 : i32, i32
  }
  func.func @transform_4(%arg0: i32) -> (i32, i32) {
    %c0_i32 = arith.constant 0 : i32
    %c0_i32_0 = arith.constant 0 : i32
    %c0_i32_1 = arith.constant 0 : i32
    return %c0_i32, %c0_i32_0 : i32, i32
  }
  func.func @transform_5(%arg0: i32) -> (i32, i32) {
    %c0_i32 = arith.constant 0 : i32
    %c0_i32_0 = arith.constant 0 : i32
    %c0_i32_1 = arith.constant 0 : i32
    return %c0_i32, %c0_i32_0 : i32, i32
  }
  func.func @transform_6(%arg0: i32) -> (i32, i32) {
    %c0_i32 = arith.constant 0 : i32
    %c0_i32_0 = arith.constant 0 : i32
    return %arg0, %c0_i32 : i32, i32
  }
}

</mosaic_0001>

<bundles_post_ra>
// kernel: _cbow_pallas.1
= control target key start
LH: loop header
LB: loop body
LE: loop exit
PB: predicated region body
PF: predicated region fallthrough
CT: control target
= control target key end

     0   :  { %11 = vsyncpa [#allocation3], 0  ;;  %s3309_s0 = inlined_call_operand.vmem [shape: s32[256,8], index: 0, kind: input, shape index: {}]   ;;  %s3310_s1 = inlined_call_operand.vmem [shape: f32[128,32], index: 1, kind: input, shape index: {}]   ;;  %s3311_s2 = inlined_call_operand.vmem [shape: f32[32,128], index: 2, kind: input, shape index: {}]   ;;  %s3312_s3 = inlined_call_operand.vmem [shape: f32[1,128], index: 3, kind: input, shape index: {}]   ;;  %s3313_s4 = inlined_call_operand.vmem [shape: f32[128,128], index: 4, kind: input, shape index: {}]   ;;  %s3314_s5 = inlined_call_operand.vmem [shape: f32[1,128], index: 5, kind: input, shape index: {}]   ;;  %s3315_s6 = inlined_call_operand.hbm [shape: f32[256,128], index: 6, kind: output, shape index: {}]  }
   0x1   :  { %13 = vsyncpa [#allocation3 + $0x1], 0  ;;  %s2217_s21 = smov 0   ;;  %s2219_s22 = smov 0  }
   0x2   :  { %s2221_s23 = smov 0   ;;  %s2223_s24 = smov 0  }
   0x3 LB: > { %s2238_s25 = sadd.s32 4294967295, %s2169_s24   ;;  %s1709_s26 = sadd.s32 4294967294, %s2169_s24   ;;  %s2169_s24 = sphi %s2223_s24, %s3345_s24   ;;  %s2165_s23 = sphi %s2221_s23, %s3344_s23   ;;  %s2161_s22 = sphi %s2219_s22, %s3343_s22   ;;  %s2157_s21 = sphi %s2217_s21, %s3342_s21  }
   0x4   : > { %s2242_s27 = sadd.s32 1, %s2169_s24   ;;  %s157_s28 = sadd.s32 1, %s2165_s23 }
   0x5   : > { %s154_s29 = ssub.s32 %s2169_s24, %s2242_s27  ;;  %p167_p0 = scmp.ne.s32.totalorder %s2165_s23, %s2161_s22 }
   0x6   : > { %p155_p1 = scmp.eq.s32.totalorder %s154_s29, 0  ;;  %p168_p2 = scmp.eq.s32.totalorder %s2238_s25, 1 }
   0x7   : > { %p173_p3 = scmp.ne.s32.totalorder %s2161_s22, %s2157_s21  ;;  %p174_p4 = scmp.eq.s32.totalorder %s1709_s26, 1 }
   0x8   : > { %s2253_s30 = scalar_select %p155_p1, %s2165_s23, %s157_s28  }
   0x9   : > { %p2255_p5 = por %p168_p2, %p167_p0  ;;  %p2259_p6 = por %p174_p4, %p173_p3 }
   0xa   : > { %p1712_p7 = scmp.ge.s32.totalorder %s2169_s24, 1  ;;  %p216_p8 = scmp.lt.s32.totalorder %s2169_s24, 3 }
   0xc   : > { %p217_p9 = pnand %p1712_p7, %p216_p8 }
   0xe   : > { %220 = sbr.rel (%p217_p9) target bundleno = 1223 (0x4c7), region = 44 }
  0x13   : > { %s1714_s9 = sshll.u32 %s2238_s25, 4  ;;  %v2171_v0 = vmov 0   ;;  %v2172_v17 = vmov 1   ;;  %v3320_v18 = vmov 2   ;;  %v3322_v20 = vmov 5   ;;  %v1166_v54 = vld [vmem:[%s3310_s1 + $0x78] sm:$0xff] }
  0x14   : > { %1950 = vset.pattern.permute.xlu2 %v2171_v0  ;;  %1949 = vset.pattern.permute.xlu1 %v2171_v0  ;;  %p247_p10 = scmp.lt.s32.totalorder %s1714_s9, 31  ;;  %v3326_v22 = vmov 3   ;;  %v3316_v24 = vmov 6   ;;  %v3318_v28 = vmov 7   ;;  %v3324_v32 = vmov 4   ;;  %v1165_v57 = vld [vmem:[%s3310_s1 + $0x70] sm:$0xff] }
  0x15   : > { %1948 = vset.pattern.permute.xlu0 %v2171_v0  ;;  %1167 = vmatpush.msra.mxu0 %v1166_v54  ;;  %v1164_v59 = vld [vmem:[%s3310_s1 + $0x68] sm:$0xff]  ;;  %v1163_v60 = vld [vmem:[%s3310_s1 + $0x60] sm:$0xff]  ;;  %v1162_v62 = vld [vmem:[%s3310_s1 + $0x58] sm:$0xff]  ;;  %s243_s17 = sand.u32 1, %s2161_s22   ;;  %s1865_s20 = sshll.u32 %s2238_s25, 7 }
  0x16   : > { %s3347_s9 = smov (!%p247_p10, %s1714_s9), 31  ;;  %1866 = vmatpush.msra.mxu3 %v1166_v54  ;;  %v1161_v63 = vld [vmem:[%s3310_s1 + $0x50] sm:$0xff]  ;;  %s1713_s18 = sshll.u32 %s243_s17, 7 }
  0x17   : > { %s1715_s10 = sshll.u32 %s3347_s9, 3  ;;  %1168 = vmatpush.msra.mxu0 %v1165_v57  ;;  %s3234_s19 = scalar_lea.vmem [#allocation2], %s1713_s18 }
  0x18   : > { %s2269_s13 = scalar_lea.vmem %s3309_s0, %s1715_s10  ;;  %1867 = vmatpush.msra.mxu3 %v1165_v57  ;;  %v1156_v57 = vld [vmem:[%s3310_s1 + $0x28] sm:$0xff]  ;;  %s1643_s29 = scalar_lea.hbm %s3315_s6, %s1865_s20 }
  0x19   : > { %v2272_v1 = vld [vmem:[%s2269_s13 + $0x20] sm:$0xff]  ;;  %v2275_v2 = vld [vmem:[%s2269_s13 + $0x10] sm:$0xff]  ;;  %v2284_v4 = vld [vmem:[%s2269_s13 + $0x28] sm:$0xff]  ;;  %1169 = vmatpush.msra.mxu0 %v1164_v59  ;;  %s1644_s9 = sshll.u32 %s3234_s19, 4  ;;  %s1646_s10 = sshll.u32 %s1643_s29, 4  ;;  %s1645_s9 = int_to_ptr.vmem [resolvable:$true] %s1644_s9  ;;  %s1647_s10 = int_to_ptr.hbm [resolvable:$true] %s1646_s10 }
  0x1a   : > { %v2278_v3 = vld [vmem:[%s2269_s13] sm:$0xff]  ;;  %284 = vperm.xlu2 %1950, %v2272_v1   ;;  %278 = vperm.xlu1 %1949, %v2275_v2   ;;  %v2287_v5 = vld [vmem:[%s2269_s13 + $0x18] sm:$0xff]  ;;  %v2290_v6 = vld [vmem:[%s2269_s13 + $0x8] sm:$0xff]  ;;  %s2121_s11 = sshra.s32 %s1647_s10, 4  ;;  %s2127_s15 = scalar_lea.hbm %s3315_s6, 256  ;;  %s2122_s11 = int_to_ptr.hbm [resolvable:$true] %s2121_s11 }
  0x1b   : > { %272 = vperm.xlu0 %1948, %v2278_v3   ;;  %v2296_v7 = vld [vmem:[%s2269_s13 + $0x40] sm:$0xff]  ;;  %v2299_v8 = vld [vmem:[%s2269_s13 + $0x38] sm:$0xff]  ;;  %v2302_v9 = vld [vmem:[%s2269_s13 + $0x30] sm:$0xff]  ;;  %1868 = vmatpush.msra.mxu3 %v1164_v59  ;;  %s2123_s25 = scalar_lea.hbm %s2122_s11, 128  ;;  %p2128_p0 = scmp.lt.s32.totalorder %s2122_s11, %s3315_s6 }
  0x1c   : > { %v2308_v10 = vld [vmem:[%s2269_s13 + $0x58] sm:$0xff]  ;;  %v2311_v11 = vld [vmem:[%s2269_s13 + $0x50] sm:$0xff]  ;;  %v2314_v12 = vld [vmem:[%s2269_s13 + $0x48] sm:$0xff]  ;;  %1170 = vmatpush.msra.mxu0 %v1163_v60  ;;  %p2124_p11 = scmp.ne.s32.totalorder %s2122_s11, %s2123_s25  ;;  %p2129_p1 = scmp.lt.s32.totalorder %s2127_s15, %s2123_s25 }
  0x1d   : > { %v2320_v13 = vld [vmem:[%s2269_s13 + $0x70] sm:$0xff]  ;;  %v2323_v14 = vld [vmem:[%s2269_s13 + $0x68] sm:$0xff]  ;;  %v2326_v15 = vld [vmem:[%s2269_s13 + $0x60] sm:$0xff]  ;;  %1869 = vmatpush.msra.mxu3 %v1163_v60 }
  0x1e   : > { %v268_v16 = vld [vmem:[%s2269_s13 + $0x78] sm:$0xff]  ;;  %1171 = vmatpush.msra.mxu0 %v1162_v62  ;;  %v1155_v59 = vld [vmem:[%s3310_s1 + $0x20] sm:$0xff]  ;;  %p2125_p12 = pnand %p2124_p11, %p2255_p5  ;;  %p2130_p2 = por %p2129_p1, %p2128_p0 }
  0x1f   : > { %1870 = vmatpush.msra.mxu3 %v1162_v62  ;;  %v1154_v60 = vld [vmem:[%s3310_s1 + $0x18] sm:$0xff] }
  0x20   : > { %1172 = vmatpush.msra.mxu0 %v1161_v63  ;;  %p2126_p13 = pneg %p2125_p12 }
  0x21   : > { %1871 = vmatpush.msra.mxu3 %v1161_v63 }
  0x22   : > { %287 = vperm.xlu2 %1950, %v2284_v4   ;;  %281 = vperm.xlu1 %1949, %v2287_v5   ;;  %p2131_p3 = pnand %p2130_p2, %p2126_p13 }
  0x23   : > { %275 = vperm.xlu0 %1948, %v2290_v6  }
  0x2a   : > { %296 = vperm.xlu2 %1950, %v2296_v7   ;;  %293 = vperm.xlu1 %1949, %v2299_v8  }
  0x2b   : > { %290 = vperm.xlu0 %1948, %v2302_v9  }
  0x32   : > { %305 = vperm.xlu2 %1950, %v2308_v10   ;;  %302 = vperm.xlu1 %1949, %v2311_v11  }
  0x33   : > { %299 = vperm.xlu0 %1948, %v2314_v12  }
  0x3a   : > { %314 = vperm.xlu2 %1950, %v2320_v13   ;;  %311 = vperm.xlu1 %1949, %v2323_v14  }
  0x3b   : > { %308 = vperm.xlu0 %1948, %v2326_v15  }
  0x42   : > { %1952 = vset.pattern.permute.xlu2 %v2172_v17  ;;  %1951 = vset.pattern.permute.xlu1 %v2172_v17 }
  0x43   : > { %317 = vperm.xlu0 %1948, %v268_v16   ;;  %371 = vperm.xlu2 %1952, %v2290_v6  }
  0x44   : > { %368 = vperm.xlu1 %1951, %v2278_v3  }
  0x4b   : > { %1953 = vset.pattern.permute.xlu0 %v2172_v17  ;;  %380 = vperm.xlu2 %1952, %v2272_v1   ;;  %v1157_v17 = vld [vmem:[%s3310_s1 + $0x30] sm:$0xff] }
  0x4c   : > { %377 = vperm.xlu1 %1951, %v2287_v5   ;;  %374 = vperm.xlu0 %1953, %v2275_v2  }
  0x53   : > { %386 = vperm.xlu2 %1952, %v2302_v9  }
  0x54   : > { %383 = vperm.xlu1 %1951, %v2284_v4   ;;  %389 = vperm.xlu0 %1953, %v2299_v8  }
  0x5b   : > { %395 = vperm.xlu2 %1952, %v2314_v12  }
  0x5c   : > { %392 = vperm.xlu1 %1951, %v2296_v7   ;;  %398 = vperm.xlu0 %1953, %v2311_v11  }
  0x63   : > { %404 = vperm.xlu2 %1952, %v2326_v15  }
  0x64   : > { %401 = vperm.xlu1 %1951, %v2308_v10   ;;  %407 = vperm.xlu0 %1953, %v2323_v14  }
  0x6b   : > { %413 = vperm.xlu2 %1952, %v268_v16  }
  0x6c   : > { %410 = vperm.xlu1 %1951, %v2320_v13   ;;  %1954 = vset.pattern.permute.xlu0 %v3320_v18 }
  0x6d   : > { %480 = vperm.xlu0 %1954, %v2278_v3  }
  0x73   : > { %1956 = vset.pattern.permute.xlu2 %v3320_v18 }
  0x74   : > { %1955 = vset.pattern.permute.xlu1 %v3320_v18  ;;  %v2351_v19 = vpop.permute.xlu2 %284  ;;  %486 = vperm.xlu2 %1956, %v2275_v2  }
  0x75   : > { %483 = vperm.xlu1 %1955, %v2290_v6   ;;  %1970 = vset.pattern.permute.xlu0 %v3322_v20 }
  0x76   : > { %825 = vperm.xlu0 %1970, %v2287_v5  }
  0x7c   : > { %v2357_v21 = vpop.permute.xlu2 %287  ;;  %1957 = vset.pattern.permute.xlu2 %v3326_v22 }
  0x7d   : > { %489 = vperm.xlu1 %1955, %v2287_v5   ;;  %592 = vperm.xlu2 %1957, %v2278_v3  }
  0x7e   : > { %1971 = vset.pattern.permute.xlu0 %v3326_v22 }
  0x7f   : > { %598 = vperm.xlu0 %1971, %v2275_v2  }
  0x84   : > { %v2364_v23 = vpop.permute.xlu2 %296 }
  0x85   : > { %1958 = vset.pattern.permute.xlu1 %v3322_v20  ;;  %1959 = vset.pattern.permute.xlu2 %v3316_v24 }
  0x86   : > { %816 = vperm.xlu1 %1958, %v2278_v3   ;;  %928 = vperm.xlu2 %1959, %v2278_v3  }
  0x87   : > { %601 = vperm.xlu0 %1971, %v2287_v5  }
  0x8c   : > { %v2371_v25 = vpop.permute.xlu2 %305  ;;  %v2373_v26 = vpop.permute.xlu1 %278 }
  0x8d   : > { %v2375_v27 = vpop.permute.xlu0 %272 }
  0x8e   : > { %1960 = vset.pattern.permute.xlu1 %v3326_v22  ;;  %1961 = vset.pattern.permute.xlu2 %v3318_v28 }
  0x8f   : > { %595 = vperm.xlu1 %1960, %v2290_v6   ;;  %610 = vperm.xlu0 %1971, %v2302_v9  }
  0x90   : > { %1040 = vperm.xlu2 %1961, %v2278_v3  }
  0x94   : > { %v2382_v29 = vpop.permute.xlu2 %314  ;;  %v2384_v30 = vpop.permute.xlu1 %281 }
  0x95   : > { %3330 = vst [vmem:[#allocation5_spill] sm:$0xff] %v2382_v29  ;;  %v2386_v31 = vpop.permute.xlu0 %275 }
  0x97   : > { %1962 = vset.pattern.permute.xlu1 %v3322_v20  ;;  %1984 = vset.pattern.permute.xlu0 %v3324_v32 }
  0x98   : > { %1963 = vset.pattern.permute.xlu2 %v3316_v24  ;;  %819 = vperm.xlu1 %1962, %v2290_v6  }
  0x99   : > { %704 = vperm.xlu0 %1984, %v2278_v3   ;;  %931 = vperm.xlu2 %1963, %v2290_v6   ;;  %v1159_v3 = vld [vmem:[%s3310_s1 + $0x40] sm:$0xff] }
  0x9c   : > { %v2394_v33 = vpop.permute.xlu1 %293 }
  0x9d   : > { %v2396_v34 = vpop.permute.xlu2 %371  ;;  %v2398_v35 = vpop.permute.xlu0 %290 }
  0xa0   : > { %1964 = vset.pattern.permute.xlu1 %v3318_v28 }
  0xa1   : > { %707 = vperm.xlu0 %1984, %v2290_v6   ;;  %1965 = vset.pattern.permute.xlu2 %v3324_v32 }
  0xa2   : > { %1043 = vperm.xlu1 %1964, %v2290_v6   ;;  %710 = vperm.xlu2 %1965, %v2275_v2  }
  0xa4   : > { %v2405_v36 = vpop.permute.xlu1 %302 }
  0xa5   : > { %v2407_v37 = vpop.permute.xlu2 %380  ;;  %v2409_v38 = vpop.permute.xlu0 %299 }
  0xa9   : > { %716 = vperm.xlu0 %1984, %v2272_v1  }
  0xaa   : > { %1966 = vset.pattern.permute.xlu1 %v3322_v20  ;;  %1967 = vset.pattern.permute.xlu2 %v3316_v24 }
  0xab   : > { %822 = vperm.xlu1 %1966, %v2275_v2   ;;  %934 = vperm.xlu2 %1967, %v2275_v2  }
  0xac   : > { %v2416_v39 = vpop.permute.xlu1 %311 }
  0xad   : > { %v2418_v40 = vpop.permute.xlu2 %386  ;;  %v2420_v41 = vpop.permute.xlu0 %308 }
  0xb1   : > { %731 = vperm.xlu0 %1984, %v2314_v12  }
  0xb3   : > { %1968 = vset.pattern.permute.xlu1 %v3318_v28  ;;  %1969 = vset.pattern.permute.xlu2 %v3324_v32 }
  0xb4   : > { %1046 = vperm.xlu1 %1968, %v2275_v2   ;;  %713 = vperm.xlu2 %1969, %v2287_v5   ;;  %v1160_v2 = vld [vmem:[%s3310_s1 + $0x48] sm:$0xff] }
  0xb5   : > { %v2427_v42 = vpop.permute.xlu2 %395  ;;  %v2429_v43 = vpop.permute.xlu0 %317  ;;  %1173 = vmatpush.msra.mxu0 %v1160_v2  ;;  %1872 = vmatpush.msra.mxu3 %v1160_v2  ;;  %v1153_v2 = vld [vmem:[%s3310_s1 + $0x10] sm:$0xff] }
  0xb6   : > { %3331 = vst [vmem:[#allocation6_spill] sm:$0xff] %v2429_v43  ;;  %v2431_v44 = vpop.permute.xlu1 %368 }
  0xb7   : > { %1174 = vmatpush.msra.mxu0 %v1159_v3  ;;  %1873 = vmatpush.msra.mxu3 %v1159_v3 }
  0xb9   : > { %2001 = vset.pattern.permute.xlu0 %v3318_v28 }
  0xba   : > { %1052 = vperm.xlu0 %2001, %v2272_v1  }
  0xbc   : > { %1972 = vset.pattern.permute.xlu1 %v3320_v18  ;;  %1973 = vset.pattern.permute.xlu2 %v3316_v24 }
  0xbd   : > { %492 = vperm.xlu1 %1972, %v2272_v1   ;;  %937 = vperm.xlu2 %1973, %v2287_v5   ;;  %v2439_v45 = vpop.permute.xlu2 %404 }
  0xbe   : > { %v2441_v46 = vpop.permute.xlu1 %377  ;;  %v2443_v47 = vpop.permute.xlu0 %374 }
  0xc2   : > { %1067 = vperm.xlu0 %2001, %v2314_v12  }
  0xc5   : > { %1974 = vset.pattern.permute.xlu1 %v3326_v22  ;;  %1975 = vset.pattern.permute.xlu2 %v3318_v28  ;;  %v2448_v48 = vpop.permute.xlu2 %413 }
  0xc6   : > { %3332 = vst [vmem:[#allocation7_spill] sm:$0xff] %v2448_v48  ;;  %604 = vperm.xlu1 %1974, %v2272_v1   ;;  %1049 = vperm.xlu2 %1975, %v2287_v5   ;;  %v2452_v49 = vpop.permute.xlu1 %383  ;;  %v2454_v50 = vpop.permute.xlu0 %389  ;;  %v1158_v5 = vld [vmem:[%s3310_s1 + $0x38] sm:$0xff] }
  0xc7   : > { %1175 = vmatpush.msra.mxu0 %v1158_v5  ;;  %1874 = vmatpush.msra.mxu3 %v1158_v5  ;;  %v1152_v5 = vld [vmem:[%s3310_s1 + $0x8] sm:$0xff] }
  0xc9   : > { %1176 = vmatpush.msra.mxu0 %v1157_v17  ;;  %1875 = vmatpush.msra.mxu3 %v1157_v17  ;;  %v1151_v17 = vld [vmem:[%s3310_s1] sm:$0xff] }
  0xca   : > { %2006 = vset.pattern.permute.xlu0 %v3320_v18 }
  0xcb   : > { %504 = vperm.xlu0 %2006, %v2296_v7   ;;  %1177 = vmatpush.msra.mxu0 %v1156_v57 }
  0xcc   : > { %1876 = vmatpush.msra.mxu3 %v1156_v57 }
  0xcd   : > { %1178 = vmatpush.msra.mxu0 %v1155_v59 }
  0xce   : > { %1976 = vset.pattern.permute.xlu1 %v3322_v20  ;;  %1977 = vset.pattern.permute.xlu2 %v3320_v18  ;;  %v2460_v51 = vpop.permute.xlu1 %392  ;;  %v2462_v52 = vpop.permute.xlu0 %398 }
  0xcf   : > { %828 = vperm.xlu1 %1976, %v2272_v1   ;;  %v2465_v53 = vpop.permute.xlu2 %486  ;;  %495 = vperm.xlu2 %1977, %v2284_v4  }
  0xd0   : > { %1179 = vmatpush.msra.mxu0 %v1154_v60  ;;  %1877 = vmatpush.msra.mxu3 %v1155_v59 }
  0xd2   : > { %1180 = vmatpush.msra.mxu0 %v1153_v2  ;;  %1878 = vmatpush.msra.mxu3 %v1154_v60 }
  0xd3   : > { %516 = vperm.xlu0 %2006, %v2326_v15  }
  0xd4   : > { %1181 = vmatpush.msra.mxu0 %v1152_v5  ;;  %1879 = vmatpush.msra.mxu3 %v1153_v2 }
  0xd6   : > { %v2472_v55 = vpop.permute.xlu1 %401  ;;  %v2474_v56 = vpop.permute.xlu0 %407  ;;  %1182 = vmatpush.msra.mxu0 %v1151_v17  ;;  %1880 = vmatpush.msra.mxu3 %v1152_v5 }
  0xd7   : > { %1978 = vset.pattern.permute.xlu1 %v3316_v24  ;;  %1979 = vset.pattern.permute.xlu2 %v3326_v22  ;;  %v2481_v58 = vpop.permute.xlu2 %592 }
  0xd8   : > { %940 = vperm.xlu1 %1978, %v2272_v1   ;;  %607 = vperm.xlu2 %1979, %v2284_v4  }
  0xd9   : > { %1881 = vmatpush.msra.mxu3 %v1151_v17  ;;  %v3333_v17 = vmov 7  }
  0xdb   : > { %2011 = vset.pattern.permute.xlu0 %v3316_v24 }
  0xdc   : > { %946 = vperm.xlu0 %2011, %v2302_v9  }
  0xde   : > { %v2493_v61 = vpop.permute.xlu1 %410 }
  0xdf   : > { %v2502_v0 = vpop.permute.xlu0 %480 }
  0xe0   : > { %1980 = vset.pattern.permute.xlu1 %v3324_v32  ;;  %1981 = vset.pattern.permute.xlu2 %v3322_v20  ;;  %v2505_v1 = vpop.permute.xlu2 %928 }
  0xe1   : > { %719 = vperm.xlu1 %1980, %v2284_v4   ;;  %831 = vperm.xlu2 %1981, %v2284_v4  }
  0xe4   : > { %964 = vperm.xlu0 %2011, %v2326_v15  }
  0xe7   : > { %v2519_v6 = vpop.permute.xlu1 %483 }
  0xe8   : > { %v2521_v16 = vpop.permute.xlu0 %825 }
  0xe9   : > { %1982 = vset.pattern.permute.xlu1 %v3320_v18  ;;  %1983 = vset.pattern.permute.xlu2 %v3316_v24 }
  0xea   : > { %498 = vperm.xlu1 %1982, %v2302_v9   ;;  %943 = vperm.xlu2 %1983, %v2284_v4   ;;  %v2530_v54 = vpop.permute.xlu2 %1040 }
  0xec   : > { %2019 = vset.pattern.permute.xlu0 %v3322_v20 }
  0xed   : > { %840 = vperm.xlu0 %2019, %v2296_v7  }
  0xef   : > { %v2543_v62 = vpop.permute.xlu1 %489 }
  0xf1   : > { %v2545_v63 = vpop.permute.xlu0 %598 }
  0xf2   : > { %1985 = vset.pattern.permute.xlu1 %v3318_v28  ;;  %1986 = vset.pattern.permute.xlu2 %v3324_v32  ;;  %v269_v28 = vlaneseq }
  0xf3   : > { %1055 = vperm.xlu1 %1985, %v2284_v4   ;;  %722 = vperm.xlu2 %1986, %v2302_v9   ;;  %v2554_v3 = vpop.permute.xlu2 %931 }
  0xf4   : > { %v2572_v59 = vand.u32 127, %v269_v28 }
  0xf5   : > { %855 = vperm.xlu0 %2019, %v2323_v14  }
  0xf6   : > { %vm319_vm0 = vcmp.eq.s32.totalorder %v2375_v27, %v2572_v59  ;;  %vm415_vm1 = vcmp.eq.s32.totalorder %v2431_v44, %v2572_v59  ;;  %vm527_vm2 = vcmp.eq.s32.totalorder %v2502_v0, %v2572_v59  ;;  %vm639_vm3 = vcmp.eq.s32.totalorder %v2481_v58, %v2572_v59 }
  0xf7   : > { %vm320_vm4 = vcmp.eq.s32.totalorder %v2386_v31, %v2572_v59  ;;  %vm416_vm5 = vcmp.eq.s32.totalorder %v2396_v34, %v2572_v59  ;;  %vm528_vm6 = vcmp.eq.s32.totalorder %v2519_v6, %v2572_v59  ;;  %v3334_v31 = vmov 4  }
  0xf8   : > { %v817_v24 = vpop.permute.xlu1 %816  ;;  %vm975_vm9 = vcmp.eq.s32.totalorder %v2505_v1, %v2572_v59  ;;  %vm1087_vm11 = vcmp.eq.s32.totalorder %v2530_v54, %v2572_v59  ;;  %vm417_vm14 = vcmp.eq.s32.totalorder %v2443_v47, %v2572_v59  ;;  %vm976_vm15 = vcmp.eq.s32.totalorder %v2554_v3, %v2572_v59 }
  0xf9   : > { %v2563_v4 = vpop.permute.xlu0 %601  ;;  %vm863_vm7 = vcmp.eq.s32.totalorder %v817_v24, %v2572_v59 }
  0xfb   : > { %1987 = vset.pattern.permute.xlu1 %v3322_v20  ;;  %1988 = vset.pattern.permute.xlu2 %v3320_v18  ;;  %v2179_v18 = vmov 0.0  }
  0xfc   : > { %834 = vperm.xlu1 %1987, %v2302_v9   ;;  %501 = vperm.xlu2 %1988, %v2299_v8   ;;  %v2569_v57 = vpop.permute.xlu2 %710  ;;  %v1716_v5 = vsel %vm319_vm0, 1.0, %v2179_v18  ;;  %v1732_v28 = vsel %vm415_vm1, 1.0, %v2179_v18  ;;  %v1748_v27 = vsel %vm527_vm2, 1.0, %v2179_v18  ;;  %v1733_v58 = vsel %vm416_vm5, 1.0, %v2179_v18 }
  0xfd   : > { %2023 = vset.pattern.permute.xlu0 %v3324_v32  ;;  %v463_v20 = vadd.f32 %v1732_v28, %v1716_v5  ;;  %v1764_v32 = vsel %vm639_vm3, 1.0, %v2179_v18  ;;  %v3335_v28 = vmov 5   ;;  %vm321_vm0 = vcmp.eq.s32.totalorder %v2373_v26, %v2572_v59 }
  0xfe   : > { %740 = vperm.xlu0 %2023, %v2326_v15   ;;  %vm529_vm1 = vcmp.eq.s32.totalorder %v2465_v53, %v2572_v59  ;;  %v1734_v3 = vsel %vm417_vm14, 1.0, %v2179_v18  ;;  %vm641_vm3 = vcmp.eq.s32.totalorder %v2545_v63, %v2572_v59  ;;  %v1813_v26 = vsel %vm976_vm15, 1.0, %v2179_v18 }
  0xff   : > { %v575_v0 = vadd.f32 %v1748_v27, %v463_v20  ;;  %v1717_v20 = vsel %vm320_vm4, 1.0, %v2179_v18  ;;  %v1718_v53 = vsel %vm321_vm0, 1.0, %v2179_v18  ;;  %vm753_vm4 = vcmp.eq.s32.totalorder %v2569_v57, %v2572_v59 }
 0x100   : > { %v464_v6 = vadd.f32 %v1733_v58, %v1717_v20  ;;  %vm418_vm5 = vcmp.eq.s32.totalorder %v2441_v46, %v2572_v59  ;;  %vm419_vm0 = vcmp.eq.s32.totalorder %v2407_v37, %v2572_v59 }
 0x101   : > { %v596_v60 = vpop.permute.xlu1 %595  ;;  %v2579_v2 = vpop.permute.xlu0 %610 }
 0x102   : > { %vm640_vm10 = vcmp.eq.s32.totalorder %v596_v60, %v2572_v59  ;;  %v1812_v60 = vsel %vm975_vm9, 1.0, %v2179_v18  ;;  %vm642_vm9 = vcmp.eq.s32.totalorder %v2563_v4, %v2572_v59 }
 0x103   : > { %v1765_v27 = vsel %vm640_vm10, 1.0, %v2179_v18 }
 0x104   : > { %1989 = vset.pattern.permute.xlu1 %v3326_v22  ;;  %1990 = vset.pattern.permute.xlu2 %v3333_v17 }
 0x105   : > { %613 = vperm.xlu1 %1989, %v2299_v8   ;;  %1058 = vperm.xlu2 %1990, %v2302_v9   ;;  %v2590_v44 = vpop.permute.xlu2 %934  ;;  %v687_v9 = vadd.f32 %v1764_v32, %v575_v0  ;;  %v1749_v32 = vsel %vm528_vm6, 1.0, %v2179_v18 }
 0x106   : > { %746 = vperm.xlu0 %2023, %v2320_v13   ;;  %v576_v0 = vadd.f32 %v1749_v32, %v464_v6  ;;  %v1750_v32 = vsel %vm529_vm1, 1.0, %v2179_v18  ;;  %v465_v6 = vadd.f32 %v1734_v3, %v1718_v53  ;;  %vm977_vm10 = vcmp.eq.s32.totalorder %v2590_v44, %v2572_v59 }
 0x107   : > { %v1767_v3 = vsel %vm642_vm9, 1.0, %v2179_v18  ;;  %vm323_vm1 = vcmp.eq.s32.totalorder %v2351_v19, %v2572_v59 }
 0x108   : > { %v688_v29 = vadd.f32 %v1765_v27, %v576_v0  ;;  %v1766_v27 = vsel %vm641_vm3, 1.0, %v2179_v18  ;;  %v577_v63 = vadd.f32 %v1750_v32, %v465_v6  ;;  %v1720_v37 = vsel %vm323_vm1, 1.0, %v2179_v18 }
 0x10a   : > { %v820_v22 = vpop.permute.xlu1 %819  ;;  %v689_v57 = vadd.f32 %v1766_v27, %v577_v63 }
 0x10b   : > { %v705_v48 = vpop.permute.xlu0 %704  ;;  %vm864_vm12 = vcmp.eq.s32.totalorder %v820_v22, %v2572_v59 }
 0x10c   : > { %vm751_vm8 = vcmp.eq.s32.totalorder %v705_v48, %v2572_v59  ;;  %v1796_v48 = vsel %vm863_vm7, 1.0, %v2179_v18  ;;  %v1797_v22 = vsel %vm864_vm12, 1.0, %v2179_v18  ;;  %vm322_vm7 = vcmp.eq.s32.totalorder %v2384_v30, %v2572_v59 }
 0x10d   : > { %v1780_v5 = vsel %vm751_vm8, 1.0, %v2179_v18  ;;  %1991 = vset.pattern.permute.xlu1 %v3334_v31  ;;  %1992 = vset.pattern.permute.xlu2 %v3335_v28  ;;  %vm530_vm8 = vcmp.eq.s32.totalorder %v2543_v62, %v2572_v59  ;;  %v1719_v30 = vsel %vm322_vm7, 1.0, %v2179_v18  ;;  %vm866_vm12 = vcmp.eq.s32.totalorder %v2521_v16, %v2572_v59 }
 0x10e   : > { %v799_v34 = vadd.f32 %v1780_v5, %v687_v9  ;;  %725 = vperm.xlu1 %1991, %v2299_v8   ;;  %837 = vperm.xlu2 %1992, %v2299_v8   ;;  %v2614_v24 = vpop.permute.xlu2 %713  ;;  %v1828_v5 = vsel %vm1087_vm11, 1.0, %v2179_v18  ;;  %v1751_v62 = vsel %vm530_vm8, 1.0, %v2179_v18  ;;  %v1799_v16 = vsel %vm866_vm12, 1.0, %v2179_v18 }
 0x10f   : > { %2032 = vset.pattern.permute.xlu0 %v3333_v17  ;;  %vm754_vm11 = vcmp.eq.s32.totalorder %v2614_v24, %v2572_v59  ;;  %vm324_vm12 = vcmp.eq.s32.totalorder %v2357_v21, %v2572_v59 }
 0x110   : > { %v911_v1 = vadd.f32 %v1796_v48, %v799_v34  ;;  %1082 = vperm.xlu0 %2032, %v2320_v13   ;;  %v3336_v34 = vmov 6  }
 0x112   : > { %v1023_v9 = vadd.f32 %v1812_v60, %v911_v1 }
 0x113   : > { %v708_v43 = vpop.permute.xlu0 %707 }
 0x114   : > { %vm752_vm13 = vcmp.eq.s32.totalorder %v708_v43, %v2572_v59  ;;  %v1044_v20 = vpop.permute.xlu1 %1043  ;;  %v1135_v58 = vadd.f32 %v1828_v5, %v1023_v9  ;;  %v3337_v43 = vmov 3   ;;  %v1782_v5 = vsel %vm753_vm4, 1.0, %v2179_v18 }
 0x115   : > { %v1781_v13 = vsel %vm752_vm13, 1.0, %v2179_v18  ;;  %vm1088_vm2 = vcmp.eq.s32.totalorder %v1044_v20, %v2572_v59  ;;  %v1735_v20 = vsel %vm418_vm5, 1.0, %v2179_v18  ;;  %vm331_vm4 = vcmp.eq.s32.totalorder %v2420_v41, %v2572_v59 }
 0x116   : > { %v800_v54 = vadd.f32 %v1781_v13, %v688_v29  ;;  %1993 = vset.pattern.permute.xlu1 %v3336_v34  ;;  %1183 = vmatmul.f32.vlgmr.msra.gmra.mxu0 %v1135_v58  ;;  %v1829_v1 = vsel %vm1088_vm2, 1.0, %v2179_v18  ;;  %v801_v13 = vadd.f32 %v1782_v5, %v689_v57  ;;  %vm427_vm5 = vcmp.eq.s32.totalorder %v2439_v45, %v2572_v59 }
 0x117   : > { %1994 = vset.pattern.permute.xlu2 %v3337_v43  ;;  %949 = vperm.xlu1 %1993, %v2299_v8   ;;  %v2640_v47 = vpop.permute.xlu2 %937 }
 0x118   : > { %v912_v29 = vadd.f32 %v1797_v22, %v800_v54  ;;  %616 = vperm.xlu2 %1994, %v2296_v7   ;;  %v466_v54 = vadd.f32 %v1735_v20, %v1719_v30  ;;  %vm978_vm14 = vcmp.eq.s32.totalorder %v2640_v47, %v2572_v59 }
 0x11a   : > { %v1024_v48 = vadd.f32 %v1813_v26, %v912_v29  ;;  %v578_v4 = vadd.f32 %v1751_v62, %v466_v54  ;;  %v1814_v29 = vsel %vm977_vm10, 1.0, %v2179_v18  ;;  %v1783_v26 = vsel %vm754_vm11, 1.0, %v2179_v18 }
 0x11b   : > { %v2653_v60 = vpop.permute.xlu0 %716  ;;  %v1736_v62 = vsel %vm419_vm0, 1.0, %v2179_v18  ;;  %vm420_vm11 = vcmp.eq.s32.totalorder %v2452_v49, %v2572_v59  ;;  %v1721_v49 = vsel %vm324_vm12, 1.0, %v2179_v18  ;;  %vm421_vm0 = vcmp.eq.s32.totalorder %v2418_v40, %v2572_v59 }
 0x11c   : > { %v1136_v0 = vadd.f32 %v1829_v1, %v1024_v48  ;;  %v690_v32 = vadd.f32 %v1767_v3, %v578_v4  ;;  %v3338_v48 = vmov 2   ;;  %v1728_v4 = vsel %vm331_vm4, 1.0, %v2179_v18 }
 0x11d   : > { %v823_v9 = vpop.permute.xlu1 %822  ;;  %vm326_vm12 = vcmp.eq.s32.totalorder %v2394_v33, %v2572_v59 }
 0x11e   : > { %vm865_vm6 = vcmp.eq.s32.totalorder %v823_v9, %v2572_v59  ;;  %1186 = vmatmul.f32.gmra.mxu0 %v1136_v0  ;;  %v802_v6 = vadd.f32 %v1783_v26, %v690_v32  ;;  %v1815_v0 = vsel %vm978_vm14, 1.0, %v2179_v18 }
 0x11f   : > { %1995 = vset.pattern.permute.xlu1 %v3333_v17  ;;  %v1798_v46 = vsel %vm865_vm6, 1.0, %v2179_v18  ;;  %vm755_vm6 = vcmp.eq.s32.totalorder %v2653_v60, %v2572_v59 }
 0x120   : > { %1996 = vset.pattern.permute.xlu2 %v3334_v31  ;;  %1061 = vperm.xlu1 %1995, %v2299_v8   ;;  %v1050_v58 = vpop.permute.xlu2 %1049  ;;  %v913_v22 = vadd.f32 %v1798_v46, %v801_v13  ;;  %v914_v9 = vadd.f32 %v1799_v16, %v802_v6 }
 0x121   : > { %728 = vperm.xlu2 %1996, %v2296_v7   ;;  %vm1090_vm15 = vcmp.eq.s32.totalorder %v1050_v58, %v2572_v59 }
 0x122   : > { %v1025_v44 = vadd.f32 %v1814_v29, %v913_v22  ;;  %v1831_v47 = vsel %vm1090_vm15, 1.0, %v2179_v18  ;;  %v1026_v5 = vadd.f32 %v1815_v0, %v914_v9  ;;  %v467_v22 = vadd.f32 %v1736_v62, %v1720_v37 }
 0x123   : > { %v2678_v8 = vpop.permute.xlu0 %731  ;;  %v1744_v29 = vsel %vm427_vm5, 1.0, %v2179_v18  ;;  %vm325_vm15 = vcmp.eq.s32.totalorder %v2398_v35, %v2572_v59  ;;  %v1738_v37 = vsel %vm421_vm0, 1.0, %v2179_v18  ;;  %vm423_vm0 = vcmp.eq.s32.totalorder %v2460_v51, %v2572_v59 }
 0x124   : > { %v1138_v20 = vadd.f32 %v1831_v47, %v1026_v5  ;;  %v475_v32 = vadd.f32 %v1744_v29, %v1728_v4  ;;  %v1722_v62 = vsel %vm325_vm15, 1.0, %v2179_v18 }
 0x126   : > { %v1047_v53 = vpop.permute.xlu1 %1046 }
 0x127   : > { %vm1089_vm13 = vcmp.eq.s32.totalorder %v1047_v53, %v2572_v59 }
 0x128   : > { %v1830_v24 = vsel %vm1089_vm13, 1.0, %v2179_v18  ;;  %1997 = vset.pattern.permute.xlu1 %v3338_v48 }
 0x129   : > { %1998 = vset.pattern.permute.xlu2 %v3336_v34  ;;  %507 = vperm.xlu1 %1997, %v2314_v12   ;;  %v2692_v1 = vpop.permute.xlu2 %495  ;;  %v1137_v27 = vadd.f32 %v1830_v24, %v1025_v44  ;;  %v1784_v44 = vsel %vm755_vm6, 1.0, %v2179_v18 }
 0x12a   : > { %952 = vperm.xlu2 %1998, %v2296_v7   ;;  %vm532_vm13 = vcmp.eq.s32.totalorder %v2692_v1, %v2572_v59 }
 0x12b   : > { %1189 = vmatmul.f32.gmra.mxu0 %v1137_v27  ;;  %v1753_v21 = vsel %vm532_vm13, 1.0, %v2179_v18 }
 0x12c   : > { %v1053_v63 = vpop.permute.xlu0 %1052 }
 0x12d   : > { %vm1091_vm9 = vcmp.eq.s32.totalorder %v1053_v63, %v2572_v59 }
 0x12e   : > { %v1832_v0 = vsel %vm1091_vm9, 1.0, %v2179_v18 }
 0x12f   : > { %v493_v57 = vpop.permute.xlu1 %492 }
 0x130   : > { %vm531_vm2 = vcmp.eq.s32.totalorder %v493_v57, %v2572_v59 }
 0x131   : > { %1999 = vset.pattern.permute.xlu1 %v3337_v43  ;;  %v1752_v54 = vsel %vm531_vm2, 1.0, %v2179_v18  ;;  %vm645_vm2 = vcmp.eq.s32.totalorder %v2579_v2, %v2572_v59 }
 0x132   : > { %2000 = vset.pattern.permute.xlu2 %v3333_v17  ;;  %619 = vperm.xlu1 %1999, %v2314_v12   ;;  %v2703_v46 = vpop.permute.xlu2 %607  ;;  %v579_v26 = vadd.f32 %v1752_v54, %v467_v22 }
 0x133   : > { %1064 = vperm.xlu2 %2000, %v2296_v7   ;;  %1192 = vmatmul.f32.gmra.mxu0 %v1138_v20  ;;  %v1737_v20 = vsel %vm420_vm11, 1.0, %v2179_v18  ;;  %vm644_vm14 = vcmp.eq.s32.totalorder %v2703_v46, %v2572_v59  ;;  %vm422_vm11 = vcmp.eq.s32.totalorder %v2454_v50, %v2572_v59  ;;  %v1723_v50 = vsel %vm326_vm12, 1.0, %v2179_v18 }
 0x134   : > { %v2705_v58 = vpop.permute.xlu0 %1067  ;;  %v1769_v46 = vsel %vm644_vm14, 1.0, %v2179_v18  ;;  %vm328_vm12 = vcmp.eq.s32.totalorder %v2409_v38, %v2572_v59 }
 0x138   : > { %v605_v13 = vpop.permute.xlu1 %604 }
 0x139   : > { %vm643_vm3 = vcmp.eq.s32.totalorder %v605_v13, %v2572_v59  ;;  %v468_v13 = vadd.f32 %v1737_v20, %v1721_v49 }
 0x13a   : > { %2002 = vset.pattern.permute.xlu1 %v3335_v28  ;;  %v1768_v3 = vsel %vm643_vm3, 1.0, %v2179_v18 }
 0x13b   : > { %2003 = vset.pattern.permute.xlu2 %v3338_v48  ;;  %843 = vperm.xlu1 %2002, %v2314_v12   ;;  %v2712_v30 = vpop.permute.xlu2 %831  ;;  %v691_v45 = vadd.f32 %v1768_v3, %v579_v26  ;;  %v580_v54 = vadd.f32 %v1753_v21, %v468_v13  ;;  %v1770_v3 = vsel %vm645_vm2, 1.0, %v2179_v18  ;;  %v1232_v13 = vld [vmem:[%s3311_s2] sm:$0xff] }
 0x13c   : > { %510 = vperm.xlu2 %2003, %v2311_v11   ;;  %vm868_vm4 = vcmp.eq.s32.totalorder %v2712_v30, %v2572_v59 }
 0x13d   : > { %v2718_v7 = vpop.permute.xlu0 %504  ;;  %v692_v40 = vadd.f32 %v1769_v46, %v580_v54 }
 0x13e   : > { %vm535_vm2 = vcmp.eq.s32.totalorder %v2718_v7, %v2572_v59 }
 0x13f   : > { %v1756_v7 = vsel %vm535_vm2, 1.0, %v2179_v18  ;;  %vm1096_vm2 = vcmp.eq.s32.totalorder %v2705_v58, %v2572_v59 }
 0x141   : > { %v829_v19 = vpop.permute.xlu1 %828 }
 0x142   : > { %vm867_vm7 = vcmp.eq.s32.totalorder %v829_v19, %v2572_v59  ;;  %v469_v19 = vadd.f32 %v1738_v37, %v1722_v62 }
 0x143   : > { %2004 = vset.pattern.permute.xlu1 %v3336_v34  ;;  %v1800_v24 = vsel %vm867_vm7, 1.0, %v2179_v18 }
 0x144   : > { %2005 = vset.pattern.permute.xlu2 %v3337_v43  ;;  %955 = vperm.xlu1 %2004, %v2314_v12   ;;  %v2736_v41 = vpop.permute.xlu2 %943  ;;  %v803_v12 = vadd.f32 %v1784_v44, %v691_v45  ;;  %v1801_v45 = vsel %vm868_vm4, 1.0, %v2179_v18 }
 0x145   : > { %622 = vperm.xlu2 %2005, %v2311_v11   ;;  %v517_v53 = vpop.permute.xlu0 %516  ;;  %vm980_vm5 = vcmp.eq.s32.totalorder %v2736_v41, %v2572_v59 }
 0x146   : > { %vm539_vm8 = vcmp.eq.s32.totalorder %v517_v53, %v2572_v59  ;;  %v915_v16 = vadd.f32 %v1800_v24, %v803_v12 }
 0x147   : > { %v1760_v60 = vsel %vm539_vm8, 1.0, %v2179_v18 }
 0x148   : > { %v2744_v6 = vadd.f32 %v1760_v60, %v475_v32  ;;  %v1817_v32 = vsel %vm980_vm5, 1.0, %v2179_v18 }
 0x14a   : > { %v941_v27 = vpop.permute.xlu1 %940 }
 0x14b   : > { %vm979_vm10 = vcmp.eq.s32.totalorder %v941_v27, %v2572_v59 }
 0x14c   : > { %v1816_v9 = vsel %vm979_vm10, 1.0, %v2179_v18  ;;  %2007 = vset.pattern.permute.xlu1 %v3334_v31 }
 0x14d   : > { %v1027_v47 = vadd.f32 %v1816_v9, %v915_v16  ;;  %2008 = vset.pattern.permute.xlu2 %v3335_v28  ;;  %734 = vperm.xlu1 %2007, %v2311_v11   ;;  %v723_v5 = vpop.permute.xlu2 %722  ;;  %v1235_v16 = vld [vmem:[%s3311_s2 + $0x18] sm:$0xff]  ;;  %v1234_v9 = vld [vmem:[%s3311_s2 + $0x10] sm:$0xff] }
 0x14e   : > { %846 = vperm.xlu2 %2008, %v2311_v11   ;;  %vm757_vm7 = vcmp.eq.s32.totalorder %v723_v5, %v2572_v59  ;;  %v947_v27 = vpop.permute.xlu0 %946  ;;  %1301 = vmatpush.msra.mxu1 %v1235_v16  ;;  %v1233_v5 = vld [vmem:[%s3311_s2 + $0x8] sm:$0xff] }
 0x14f   : > { %v1139_v63 = vadd.f32 %v1832_v0, %v1027_v47  ;;  %vm981_vm8 = vcmp.eq.s32.totalorder %v947_v27, %v2572_v59 }
 0x150   : > { %1302 = vmatpush.msra.mxu1 %v1234_v9 }
 0x151   : > { %1195 = vmatmul.f32.gmra.mxu0 %v1139_v63  ;;  %v1818_v63 = vsel %vm981_vm8, 1.0, %v2179_v18 }
 0x152   : > { %1303 = vmatpush.msra.mxu1 %v1233_v5 }
 0x153   : > { %v720_v57 = vpop.permute.xlu1 %719 }
 0x154   : > { %vm756_vm1 = vcmp.eq.s32.totalorder %v720_v57, %v2572_v59  ;;  %1304 = vmatpush.msra.mxu1 %v1232_v13 }
 0x155   : > { %2009 = vset.pattern.permute.xlu1 %v3338_v48  ;;  %v1785_v35 = vsel %vm756_vm1, 1.0, %v2179_v18  ;;  %vm327_vm1 = vcmp.eq.s32.totalorder %v2364_v23, %v2572_v59 }
 0x156   : > { %2010 = vset.pattern.permute.xlu2 %v3336_v34  ;;  %513 = vperm.xlu1 %2009, %v2308_v10   ;;  %v2773_v1 = vpop.permute.xlu2 %501  ;;  %v804_v4 = vadd.f32 %v1785_v35, %v692_v40  ;;  %v1739_v35 = vsel %vm422_vm11, 1.0, %v2179_v18  ;;  %v1724_v23 = vsel %vm327_vm1, 1.0, %v2179_v18 }
 0x157   : > { %958 = vperm.xlu2 %2010, %v2311_v11   ;;  %vm534_vm13 = vcmp.eq.s32.totalorder %v2773_v1, %v2572_v59  ;;  %v470_v33 = vadd.f32 %v1739_v35, %v1723_v50 }
 0x158   : > { %v916_v30 = vadd.f32 %v1801_v45, %v804_v4  ;;  %v2103_v4 = vld [vmem:[%s2269_s13 + $0x60] sm:$0xff] }
 0x15a   : > { %v1028_v60 = vadd.f32 %v1817_v32, %v916_v30 }
 0x15c   : > { %v499_v22 = vpop.permute.xlu1 %498 }
 0x15d   : > { %vm533_vm3 = vcmp.eq.s32.totalorder %v499_v22, %v2572_v59  ;;  %v2844_v22 = vpop.permute.xlu0 %964 }
 0x15e   : > { %v1754_v29 = vsel %vm533_vm3, 1.0, %v2179_v18  ;;  %2012 = vset.pattern.permute.xlu1 %v3337_v43 }
 0x15f   : > { %v581_v26 = vadd.f32 %v1754_v29, %v469_v19  ;;  %2013 = vset.pattern.permute.xlu2 %v3333_v17  ;;  %625 = vperm.xlu1 %2012, %v2308_v10   ;;  %v1059_v2 = vpop.permute.xlu2 %1058 }
 0x160   : > { %1070 = vperm.xlu2 %2013, %v2311_v11   ;;  %v1786_v11 = vsel %vm757_vm7, 1.0, %v2179_v18  ;;  %vm1093_vm9 = vcmp.eq.s32.totalorder %v1059_v2, %v2572_v59  ;;  %v2104_v2 = vld [vmem:[%s2269_s13 + $0x68] sm:$0xff]  ;;  %vm1240_vm7 = vcmask 261120  }
 0x161   : > { %v693_v53 = vadd.f32 %v1770_v3, %v581_v26  ;;  %v1834_v49 = vsel %vm1093_vm9, 1.0, %v2179_v18  ;;  %v1740_v26 = vsel %vm423_vm0, 1.0, %v2179_v18 }
 0x163   : > { %v805_v47 = vadd.f32 %v1786_v11, %v693_v53  ;;  %v471_v53 = vadd.f32 %v1740_v26, %v1724_v23 }
 0x165   : > { %v1056_v44 = vpop.permute.xlu1 %1055 }
 0x166   : > { %vm1092_vm6 = vcmp.eq.s32.totalorder %v1056_v44, %v2572_v59  ;;  %v841_v44 = vpop.permute.xlu0 %840 }
 0x167   : > { %v1833_v24 = vsel %vm1092_vm6, 1.0, %v2179_v18  ;;  %628 = vperm.xlu1 %2012, %v2326_v15   ;;  %vm871_vm8 = vcmp.eq.s32.totalorder %v841_v44, %v2572_v59 }
 0x168   : > { %2014 = vset.pattern.permute.xlu2 %v3334_v31  ;;  %v2799_v12 = vpop.permute.xlu2 %837  ;;  %v1140_v41 = vadd.f32 %v1833_v24, %v1028_v60  ;;  %v583_v24 = vadd.f32 %v1756_v7, %v471_v53 }
 0x169   : > { %737 = vperm.xlu2 %2014, %v2308_v10   ;;  %vm870_vm3 = vcmp.eq.s32.totalorder %v2799_v12, %v2572_v59 }
 0x16a   : > { %1198 = vmatmul.f32.gmra.mxu0 %v1140_v41  ;;  %v1803_v30 = vsel %vm870_vm3, 1.0, %v2179_v18  ;;  %vm425_vm3 = vcmp.eq.s32.totalorder %v2462_v52, %v2572_v59 }
 0x16b   : > { %v1742_v23 = vsel %vm425_vm3, 1.0, %v2179_v18 }
 0x16e   : > { %v835_v0 = vpop.permute.xlu1 %834 }
 0x16f   : > { %vm869_vm10 = vcmp.eq.s32.totalorder %v835_v0, %v2572_v59  ;;  %2015 = vset.pattern.permute.xlu1 %v3335_v28  ;;  %v2105_v0 = vld [vmem:[%s2269_s13 + $0x70] sm:$0xff] }
 0x170   : > { %v1802_v57 = vsel %vm869_vm10, 1.0, %v2179_v18  ;;  %849 = vperm.xlu1 %2015, %v2308_v10  }
 0x171   : > { %v917_v20 = vadd.f32 %v1802_v57, %v805_v47  ;;  %2016 = vset.pattern.permute.xlu2 %v3335_v28  ;;  %v1804_v57 = vsel %vm871_vm8, 1.0, %v2179_v18 }
 0x172   : > { %852 = vperm.xlu2 %2016, %v2326_v15   ;;  %v617_v21 = vpop.permute.xlu2 %616 }
 0x173   : > { %v1029_v46 = vadd.f32 %v1818_v63, %v917_v20  ;;  %vm647_vm4 = vcmp.eq.s32.totalorder %v617_v21, %v2572_v59 }
 0x174   : > { %v1772_v32 = vsel %vm647_vm4, 1.0, %v2179_v18 }
 0x175   : > { %v1141_v62 = vadd.f32 %v1834_v49, %v1029_v46  ;;  %v695_v27 = vadd.f32 %v1772_v32, %v583_v24 }
 0x177   : > { %v614_v37 = vpop.permute.xlu1 %613  ;;  %1201 = vmatmul.f32.gmra.mxu0 %v1141_v62 }
 0x178   : > { %2017 = vset.pattern.permute.xlu1 %v3336_v34  ;;  %vm646_vm14 = vcmp.eq.s32.totalorder %v614_v37, %v2572_v59 }
 0x179   : > { %961 = vperm.xlu1 %2017, %v2308_v10   ;;  %v1771_v1 = vsel %vm646_vm14, 1.0, %v2179_v18 }
 0x17a   : > { %2018 = vset.pattern.permute.xlu2 %v3338_v48 }
 0x17b   : > { %519 = vperm.xlu2 %2018, %v2323_v14   ;;  %v729_v54 = vpop.permute.xlu2 %728 }
 0x17c   : > { %vm759_vm6 = vcmp.eq.s32.totalorder %v729_v54, %v2572_v59 }
 0x17d   : > { %v1788_v41 = vsel %vm759_vm6, 1.0, %v2179_v18 }
 0x17e   : > { %v807_v5 = vadd.f32 %v1788_v41, %v695_v27 }
 0x180   : > { %v726_v15 = vpop.permute.xlu1 %725  ;;  %v919_v21 = vadd.f32 %v1804_v57, %v807_v5  ;;  %v2939_v5 = vpop.permute.xlu0 %855 }
 0x181   : > { %2020 = vset.pattern.permute.xlu1 %v3333_v17  ;;  %vm758_vm15 = vcmp.eq.s32.totalorder %v726_v15, %v2572_v59  ;;  %v1725_v15 = vsel %vm328_vm12, 1.0, %v2179_v18 }
 0x182   : > { %1073 = vperm.xlu1 %2020, %v2308_v10   ;;  %v1755_v10 = vsel %vm534_vm13, 1.0, %v2179_v18  ;;  %v1787_v3 = vsel %vm758_vm15, 1.0, %v2179_v18  ;;  %vm424_vm13 = vcmp.eq.s32.totalorder %v2427_v42, %v2572_v59  ;;  %vm760_vm15 = vcmp.eq.s32.totalorder %v2678_v8, %v2572_v59 }
 0x183   : > { %2021 = vset.pattern.permute.xlu2 %v3337_v43  ;;  %v582_v19 = vadd.f32 %v1755_v10, %v470_v33  ;;  %v1741_v35 = vsel %vm424_vm13, 1.0, %v2179_v18  ;;  %v1789_v33 = vsel %vm760_vm15, 1.0, %v2179_v18 }
 0x184   : > { %631 = vperm.xlu2 %2021, %v2323_v14   ;;  %v953_v40 = vpop.permute.xlu2 %952  ;;  %v472_v10 = vadd.f32 %v1741_v35, %v1725_v15  ;;  %v1382_v35 = vld [vmem:[%s3313_s4 + $0x60] sm:$0xff] }
 0x185   : > { %v694_v29 = vadd.f32 %v1771_v1, %v582_v19  ;;  %vm983_vm10 = vcmp.eq.s32.totalorder %v953_v40, %v2572_v59 }
 0x186   : > { %v1820_v49 = vsel %vm983_vm10, 1.0, %v2179_v18 }
 0x187   : > { %v806_v51 = vadd.f32 %v1787_v3, %v694_v29  ;;  %v1031_v46 = vadd.f32 %v1820_v49, %v919_v21  ;;  %v1385_v21 = vld [vmem:[%s3313_s4 + $0x78] sm:$0xff] }
 0x188   : > { %v741_v49 = vpop.permute.xlu0 %740  ;;  %1390 = vmatpush.msra.mxu2 %v1385_v21  ;;  %1882 = vmatpush.msrb.mxu3 %v1385_v21 }
 0x189   : > { %v950_v14 = vpop.permute.xlu1 %949  ;;  %v918_v12 = vadd.f32 %v1803_v30, %v806_v51  ;;  %vm763_vm13 = vcmp.eq.s32.totalorder %v741_v49, %v2572_v59 }
 0x18a   : > { %1076 = vperm.xlu1 %2020, %v2103_v4   ;;  %vm982_vm5 = vcmp.eq.s32.totalorder %v950_v14, %v2572_v59  ;;  %v2106_v14 = vld [vmem:[%s2269_s13 + $0x78] sm:$0xff]  ;;  %s1632_s13 = scalar_lea.sflag [#allocation3], %s243_s17 }
 0x18b   : > { %v1819_v60 = vsel %vm982_vm5, 1.0, %v2179_v18  ;;  %vm329_vm5 = vcmp.eq.s32.totalorder %v2405_v36, %v2572_v59 }
 0x18c   : > { %2022 = vset.pattern.permute.xlu2 %v3334_v31  ;;  %v1030_v16 = vadd.f32 %v1819_v60, %v918_v12  ;;  %v1726_v7 = vsel %vm329_vm5, 1.0, %v2179_v18 }
 0x18d   : > { %743 = vperm.xlu2 %2022, %v2104_v2   ;;  %v1065_v45 = vpop.permute.xlu2 %1064  ;;  %v473_v30 = vadd.f32 %v1742_v23, %v1726_v7 }
 0x18e   : > { %vm1095_vm11 = vcmp.eq.s32.totalorder %v1065_v45, %v2572_v59 }
 0x18f   : > { %v1836_v13 = vsel %vm1095_vm11, 1.0, %v2179_v18 }
 0x190   : > { %v1143_v54 = vadd.f32 %v1836_v13, %v1031_v46  ;;  %v1384_v13 = vld [vmem:[%s3313_s4 + $0x70] sm:$0xff] }
 0x191   : > { %1391 = vmatpush.msra.mxu2 %v1384_v13  ;;  %1883 = vmatpush.msrb.mxu3 %v1384_v13 }
 0x192   : > { %2024 = vset.pattern.permute.xlu1 %v3338_v48  ;;  %v1062_v11 = vpop.permute.xlu1 %1061 }
 0x193   : > { %vm1094_vm9 = vcmp.eq.s32.totalorder %v1062_v11, %v2572_v59  ;;  %522 = vperm.xlu1 %2024, %v2105_v0   ;;  %v1184_v9 = vpop.f32.mrf.mxu0 }
 0x194   : > { %v1835_v47 = vsel %vm1094_vm9, 1.0, %v2179_v18  ;;  %1844 = vmatmul.msk.f32.vlgmr.msra.gmra.mxu1 %vm1240_vm7, %v1184_v9 }
 0x195   : > { %2025 = vset.pattern.permute.xlu2 %v3336_v34  ;;  %v1142_v63 = vadd.f32 %v1835_v47, %v1030_v16 }
 0x196   : > { %967 = vperm.xlu2 %2025, %v2104_v2   ;;  %v2879_v20 = vpop.permute.xlu2 %510 }
 0x197   : > { %1204 = vmatmul.f32.gmra.mxu0 %v1142_v63  ;;  %vm537_vm6 = vcmp.eq.s32.totalorder %v2879_v20, %v2572_v59 }
 0x198   : > { %v1758_v36 = vsel %vm537_vm6, 1.0, %v2179_v18 }
 0x199   : > { %v585_v44 = vadd.f32 %v1758_v36, %v473_v30  ;;  %v1372_v36 = vld [vmem:[%s3313_s4 + $0x10] sm:$0xff] }
 0x19b   : > { %2026 = vset.pattern.permute.xlu1 %v3337_v43  ;;  %v508_v62 = vpop.permute.xlu1 %507  ;;  %v1187_v37 = vpop.f32.mrf.mxu0 }
 0x19c   : > { %634 = vperm.xlu1 %2026, %v2105_v0   ;;  %1845 = vmatmul.msk.f32.gmra.mxu1 %vm1240_vm7, %v1187_v37  ;;  %vm536_vm14 = vcmp.eq.s32.totalorder %v508_v62, %v2572_v59  ;;  %v1383_v62 = vld [vmem:[%s3313_s4 + $0x68] sm:$0xff] }
 0x19d   : > { %v1757_v50 = vsel %vm536_vm14, 1.0, %v2179_v18  ;;  %1392 = vmatpush.msra.mxu2 %v1383_v62  ;;  %1884 = vmatpush.msrb.mxu3 %v1383_v62 }
 0x19e   : > { %2027 = vset.pattern.permute.xlu2 %v3333_v17  ;;  %v584_v42 = vadd.f32 %v1757_v50, %v472_v10  ;;  %v1381_v10 = vld [vmem:[%s3313_s4 + $0x58] sm:$0xff] }
 0x19f   : > { %1079 = vperm.xlu2 %2027, %v2104_v2   ;;  %1207 = vmatmul.f32.gmra.mxu0 %v1143_v54  ;;  %v623_v40 = vpop.permute.xlu2 %622  ;;  %v1792_v54 = vsel %vm763_vm13, 1.0, %v2179_v18 }
 0x1a0   : > { %vm649_vm8 = vcmp.eq.s32.totalorder %v623_v40, %v2572_v59  ;;  %1393 = vmatpush.msra.mxu2 %v1382_v35  ;;  %1885 = vmatpush.msrb.mxu3 %v1382_v35 }
 0x1a1   : > { %v1774_v32 = vsel %vm649_vm8, 1.0, %v2179_v18 }
 0x1a2   : > { %v697_v24 = vadd.f32 %v1774_v32, %v585_v44  ;;  %1394 = vmatpush.msra.mxu2 %v1381_v10  ;;  %1886 = vmatpush.msrb.mxu3 %v1381_v10  ;;  %v1371_v32 = vld [vmem:[%s3313_s4 + $0x8] sm:$0xff] }
 0x1a4   : > { %2028 = vset.pattern.permute.xlu1 %v3335_v28  ;;  %v620_v38 = vpop.permute.xlu1 %619 }
 0x1a5   : > { %vm648_vm0 = vcmp.eq.s32.totalorder %v620_v38, %v2572_v59  ;;  %858 = vperm.xlu1 %2028, %v2105_v0  }
 0x1a6   : > { %v1773_v1 = vsel %vm648_vm0, 1.0, %v2179_v18  ;;  %vm987_vm0 = vcmp.eq.s32.totalorder %v2844_v22, %v2572_v59  ;;  %v1380_v22 = vld [vmem:[%s3313_s4 + $0x50] sm:$0xff] }
 0x1a7   : > { %v696_v19 = vadd.f32 %v1773_v1, %v584_v42  ;;  %2029 = vset.pattern.permute.xlu2 %v3338_v48  ;;  %v1824_v38 = vsel %vm987_vm0, 1.0, %v2179_v18  ;;  %1395 = vmatpush.msra.mxu2 %v1380_v22 }
 0x1a8   : > { %525 = vperm.xlu2 %2029, %v2106_v14   ;;  %v1190_v3 = vpop.f32.mrf.mxu0  ;;  %v847_v4 = vpop.permute.xlu2 %846  ;;  %1887 = vmatpush.msrb.mxu3 %v1380_v22 }
 0x1a9   : > { %1846 = vmatmul.msk.f32.gmra.mxu1 %vm1240_vm7, %v1190_v3  ;;  %v808_v8 = vadd.f32 %v1789_v33, %v696_v19  ;;  %vm873_vm9 = vcmp.eq.s32.totalorder %v847_v4, %v2572_v59  ;;  %v1379_v19 = vld [vmem:[%s3313_s4 + $0x48] sm:$0xff]  ;;  %v1377_v4 = vld [vmem:[%s3313_s4 + $0x38] sm:$0xff] }
 0x1aa   : > { %v1806_v41 = vsel %vm873_vm9, 1.0, %v2179_v18  ;;  %1396 = vmatpush.msra.mxu2 %v1379_v19  ;;  %1888 = vmatpush.msrb.mxu3 %v1379_v19  ;;  %vm428_vm9 = vcmp.eq.s32.totalorder %v2474_v56, %v2572_v59 }
 0x1ab   : > { %v1745_v56 = vsel %vm428_vm9, 1.0, %v2179_v18 }
 0x1ad   : > { %2030 = vset.pattern.permute.xlu1 %v3336_v34  ;;  %v844_v29 = vpop.permute.xlu1 %843 }
 0x1ae   : > { %970 = vperm.xlu1 %2030, %v2105_v0   ;;  %vm872_vm1 = vcmp.eq.s32.totalorder %v844_v29, %v2572_v59 }
 0x1af   : > { %v1805_v51 = vsel %vm872_vm1, 1.0, %v2179_v18  ;;  %vm426_vm1 = vcmp.eq.s32.totalorder %v2472_v55, %v2572_v59 }
 0x1b0   : > { %2031 = vset.pattern.permute.xlu2 %v3337_v43  ;;  %v1193_v26 = vpop.f32.mrf.mxu0  ;;  %v920_v45 = vadd.f32 %v1805_v51, %v808_v8  ;;  %v1837_v43 = vsel %vm1096_vm2, 1.0, %v2179_v18  ;;  %vm330_vm2 = vcmp.eq.s32.totalorder %v2371_v25, %v2572_v59  ;;  %v1743_v3 = vsel %vm426_vm1, 1.0, %v2179_v18  ;;  %v1376_v25 = vld [vmem:[%s3313_s4 + $0x30] sm:$0xff]  ;;  %v1375_v51 = vld [vmem:[%s3313_s4 + $0x28] sm:$0xff] }
 0x1b1   : > { %637 = vperm.xlu2 %2031, %v2106_v14   ;;  %1847 = vmatmul.msk.f32.gmra.mxu1 %vm1240_vm7, %v1193_v26  ;;  %v959_v48 = vpop.permute.xlu2 %958  ;;  %v1727_v8 = vsel %vm330_vm2, 1.0, %v2179_v18 }
 0x1b2   : > { %vm985_vm10 = vcmp.eq.s32.totalorder %v959_v48, %v2572_v59  ;;  %v474_v26 = vadd.f32 %v1743_v3, %v1727_v8 }
 0x1b6   : > { %2033 = vset.pattern.permute.xlu1 %v3334_v31  ;;  %v956_v2 = vpop.permute.xlu1 %955 }
 0x1b7   : > { %vm984_vm4 = vcmp.eq.s32.totalorder %v956_v2, %v2572_v59  ;;  %749 = vperm.xlu1 %2033, %v2106_v14  }
 0x1b8   : > { %v1821_v58 = vsel %vm984_vm4, 1.0, %v2179_v18 }
 0x1b9   : > { %v1032_v52 = vadd.f32 %v1821_v58, %v920_v45  ;;  %2034 = vset.pattern.permute.xlu2 %v3335_v28  ;;  %v1374_v58 = vld [vmem:[%s3313_s4 + $0x20] sm:$0xff] }
 0x1ba   : > { %v1071_v31 = vpop.permute.xlu2 %1070  ;;  %861 = vperm.xlu2 %2034, %v2106_v14  }
 0x1bb   : > { %v1144_v53 = vadd.f32 %v1837_v43, %v1032_v52  ;;  %vm1097_vm12 = vcmp.eq.s32.totalorder %v1071_v31, %v2572_v59  ;;  %v1373_v31 = vld [vmem:[%s3313_s4 + $0x18] sm:$0xff] }
 0x1bc   : > { %v1838_v16 = vsel %vm1097_vm12, 1.0, %v2179_v18 }
 0x1bd   : > { %1210 = vmatmul.f32.gmra.mxu0 %v1144_v53 }
 0x1bf   : > { %2035 = vset.pattern.permute.xlu1 %v3336_v34  ;;  %v735_v60 = vpop.permute.xlu1 %734  ;;  %v1822_v34 = vsel %vm985_vm10, 1.0, %v2179_v18  ;;  %vm332_vm10 = vcmp.eq.s32.totalorder %v2416_v39, %v2572_v59 }
 0x1c0   : > { %vm761_vm11 = vcmp.eq.s32.totalorder %v735_v60, %v2572_v59  ;;  %973 = vperm.xlu1 %2035, %v2106_v14  }
 0x1c1   : > { %v1790_v28 = vsel %vm761_vm11, 1.0, %v2179_v18 }
 0x1c2   : > { %v809_v12 = vadd.f32 %v1790_v28, %v697_v24  ;;  %2036 = vset.pattern.permute.xlu2 %v3333_v17 }
 0x1c3   : > { %v2936_v11 = vpop.permute.xlu2 %737  ;;  %1085 = vperm.xlu2 %2036, %v2106_v14   ;;  %v1378_v14 = vld [vmem:[%s3313_s4 + $0x40] sm:$0xff] }
 0x1c4   : > { %v921_v27 = vadd.f32 %v1806_v41, %v809_v12  ;;  %1397 = vmatpush.msra.mxu2 %v1378_v14  ;;  %1889 = vmatpush.msrb.mxu3 %v1378_v14  ;;  %vm762_vm5 = vcmp.eq.s32.totalorder %v2936_v11, %v2572_v59  ;;  %v1370_v12 = vld [vmem:[%s3313_s4] sm:$0xff]  ;;  %v1729_v11 = vsel %vm332_vm10, 1.0, %v2179_v18 }
 0x1c5   : > { %v1791_v52 = vsel %vm762_vm5, 1.0, %v2179_v18 }
 0x1c6   : > { %v1033_v0 = vadd.f32 %v1822_v34, %v921_v27  ;;  %1398 = vmatpush.msra.mxu2 %v1377_v4  ;;  %1890 = vmatpush.msrb.mxu3 %v1377_v4 }
 0x1c8   : > { %v514_v9 = vpop.permute.xlu1 %513  ;;  %v1145_v47 = vadd.f32 %v1838_v16, %v1033_v0  ;;  %1399 = vmatpush.msra.mxu2 %v1376_v25  ;;  %1891 = vmatpush.msrb.mxu3 %v1376_v25  ;;  %v476_v16 = vadd.f32 %v1745_v56, %v1729_v11 }
 0x1c9   : > { %vm538_vm3 = vcmp.eq.s32.totalorder %v514_v9, %v2572_v59 }
 0x1ca   : > { %1213 = vmatmul.f32.gmra.mxu0 %v1145_v47  ;;  %v1759_v29 = vsel %vm538_vm3, 1.0, %v2179_v18  ;;  %1400 = vmatpush.msra.mxu2 %v1375_v51  ;;  %vm429_vm3 = vcmp.eq.s32.totalorder %v2493_v61, %v2572_v59 }
 0x1cb   : > { %v586_v45 = vadd.f32 %v1759_v29, %v474_v26  ;;  %1892 = vmatpush.msrb.mxu3 %v1375_v51  ;;  %v1746_v22 = vsel %vm429_vm3, 1.0, %v2179_v18 }
 0x1cc   : > { %v853_v63 = vpop.permute.xlu2 %852  ;;  %1401 = vmatpush.msra.mxu2 %v1374_v58 }
 0x1cd   : > { %vm875_vm14 = vcmp.eq.s32.totalorder %v853_v63, %v2572_v59  ;;  %1893 = vmatpush.msrb.mxu3 %v1374_v58 }
 0x1ce   : > { %v1196_v57 = vpop.f32.mrf.mxu0  ;;  %v1808_v40 = vsel %vm875_vm14, 1.0, %v2179_v18  ;;  %1402 = vmatpush.msra.mxu2 %v1373_v31 }
 0x1cf   : > { %1848 = vmatmul.msk.f32.gmra.mxu1 %vm1240_vm7, %v1196_v57  ;;  %1894 = vmatpush.msrb.mxu3 %v1373_v31 }
 0x1d0   : > { %1403 = vmatpush.msra.mxu2 %v1372_v36 }
 0x1d1   : > { %v626_v17 = vpop.permute.xlu1 %625  ;;  %1895 = vmatpush.msrb.mxu3 %v1372_v36  ;;  %v3340_v36 = vld [vmem:[#allocation6_spill] sm:$0xff] }
 0x1d2   : > { %vm650_vm4 = vcmp.eq.s32.totalorder %v626_v17, %v2572_v59  ;;  %1404 = vmatpush.msra.mxu2 %v1371_v32 }
 0x1d3   : > { %v1775_v2 = vsel %vm650_vm4, 1.0, %v2179_v18  ;;  %1896 = vmatpush.msrb.mxu3 %v1371_v32 }
 0x1d4   : > { %v698_v23 = vadd.f32 %v1775_v2, %v586_v45  ;;  %1405 = vmatpush.msra.mxu2 %v1370_v12 }
 0x1d5   : > { %v2942_v20 = vpop.permute.xlu2 %519  ;;  %1897 = vmatpush.msrb.mxu3 %v1370_v12 }
 0x1d6   : > { %v810_v53 = vadd.f32 %v1791_v52, %v698_v23  ;;  %vm540_vm11 = vcmp.eq.s32.totalorder %v2942_v20, %v2572_v59 }
 0x1d7   : > { %v1761_v27 = vsel %vm540_vm11, 1.0, %v2179_v18 }
 0x1d8   : > { %v588_v9 = vadd.f32 %v1761_v27, %v476_v16 }
 0x1d9   : > { %v629_v46 = vpop.permute.xlu1 %628 }
 0x1da   : > { %vm651_vm15 = vcmp.eq.s32.totalorder %v629_v46, %v2572_v59 }
 0x1db   : > { %v1776_v37 = vsel %vm651_vm15, 1.0, %v2179_v18  ;;  %vm876_vm15 = vcmp.eq.s32.totalorder %v2939_v5, %v2572_v59 }
 0x1dc   : > { %v699_v15 = vadd.f32 %v1776_v37, %v2744_v6  ;;  %v1809_v13 = vsel %vm876_vm15, 1.0, %v2179_v18 }
 0x1de   : > { %v811_v50 = vadd.f32 %v1792_v54, %v699_v15  ;;  %v2969_v42 = vpop.permute.xlu2 %631 }
 0x1df   : > { %vm652_vm13 = vcmp.eq.s32.totalorder %v2969_v42, %v2572_v59  ;;  %v3339_v42 = vld [vmem:[#allocation5_spill] sm:$0xff] }
 0x1e0   : > { %v923_v6 = vadd.f32 %v1808_v40, %v811_v50  ;;  %v1777_v0 = vsel %vm652_vm13, 1.0, %v2179_v18  ;;  %v3054_v40 = vld [vmem:[%s3312_s3] ss:$0 sm:$0xff]  ;;  %vm333_vm4 = vcmp.eq.s32.totalorder %v3339_v42, %v2572_v59 }
 0x1e1   : > { %v700_v57 = vadd.f32 %v1777_v0, %v588_v9  ;;  %v1730_v61 = vsel %vm333_vm4, 1.0, %v2179_v18 }
 0x1e2   : > { %v850_v33 = vpop.permute.xlu1 %849  ;;  %v2974_v1 = vadd.f32 %v1824_v38, %v923_v6  ;;  %v747_v6 = vpop.permute.xlu0 %746  ;;  %v477_v14 = vadd.f32 %v1746_v22, %v1730_v61 }
 0x1e3   : > { %vm874_vm6 = vcmp.eq.s32.totalorder %v850_v33, %v2572_v59 }
 0x1e4   : > { %v1807_v7 = vsel %vm874_vm6, 1.0, %v2179_v18 }
 0x1e5   : > { %v922_v44 = vadd.f32 %v1807_v7, %v810_v53  ;;  %v3341_v53 = vld [vmem:[#allocation7_spill] sm:$0xff] }
 0x1e6   : > { %vm430_vm13 = vcmp.eq.s32.totalorder %v3341_v53, %v2572_v59 }
 0x1e7   : > { %v1199_v55 = vpop.f32.mrf.mxu0  ;;  %v744_v48 = vpop.permute.xlu2 %743 }
 0x1e8   : > { %1849 = vmatmul.msk.f32.gmra.mxu1 %vm1240_vm7, %v1199_v55  ;;  %vm764_vm14 = vcmp.eq.s32.totalorder %v744_v48, %v2572_v59 }
 0x1e9   : > { %v1793_v47 = vsel %vm764_vm14, 1.0, %v2179_v18 }
 0x1ea   : > { %v812_v49 = vadd.f32 %v1793_v47, %v700_v57  ;;  %v1083_v26 = vpop.permute.xlu0 %1082 }
 0x1eb   : > { %v962_v43 = vpop.permute.xlu1 %961  ;;  %vm1101_vm10 = vcmp.eq.s32.totalorder %v1083_v26, %v2572_v59 }
 0x1ec   : > { %vm986_vm8 = vcmp.eq.s32.totalorder %v962_v43, %v2572_v59  ;;  %v924_v62 = vadd.f32 %v1809_v13, %v812_v49  ;;  %v1842_v7 = vsel %vm1101_vm10, 1.0, %v2179_v18 }
 0x1ed   : > { %v1823_v30 = vsel %vm986_vm8, 1.0, %v2179_v18  ;;  %vm765_vm8 = vcmp.eq.s32.totalorder %v747_v6, %v2572_v59 }
 0x1ee   : > { %v1034_v41 = vadd.f32 %v1823_v30, %v922_v44  ;;  %v1794_v51 = vsel %vm765_vm8, 1.0, %v2179_v18 }
 0x1f0   : > { %v968_v60 = vpop.permute.xlu2 %967 }
 0x1f1   : > { %vm988_vm1 = vcmp.eq.s32.totalorder %v968_v60, %v2572_v59 }
 0x1f2   : > { %v1825_v46 = vsel %vm988_vm1, 1.0, %v2179_v18 }
 0x1f3   : > { %v1036_v37 = vadd.f32 %v1825_v46, %v924_v62 }
 0x1f4   : > { %v1074_v24 = vpop.permute.xlu1 %1073  ;;  %v1202_v28 = vpop.f32.mrf.mxu0 }
 0x1f5   : > { %vm1098_vm12 = vcmp.eq.s32.totalorder %v1074_v24, %v2572_v59  ;;  %1850 = vmatmul.msk.f32.gmra.mxu1 %vm1240_vm7, %v1202_v28  ;;  %v1747_v24 = vsel %vm430_vm13, 1.0, %v2179_v18 }
 0x1f6   : > { %v1839_v34 = vsel %vm1098_vm12, 1.0, %v2179_v18  ;;  %vm334_vm12 = vcmp.eq.s32.totalorder %v3340_v36, %v2572_v59 }
 0x1f7   : > { %v1146_v39 = vadd.f32 %v1839_v34, %v1034_v41  ;;  %v1731_v60 = vsel %vm334_vm12, 1.0, %v2179_v18 }
 0x1f8   : > { %v478_v56 = vadd.f32 %v1747_v24, %v1731_v60 }
 0x1f9   : > { %1216 = vmatmul.f32.gmra.mxu0 %v1146_v39  ;;  %v1080_v17 = vpop.permute.xlu2 %1079 }
 0x1fa   : > { %vm1100_vm2 = vcmp.eq.s32.totalorder %v1080_v17, %v2572_v59 }
 0x1fb   : > { %v1841_v5 = vsel %vm1100_vm2, 1.0, %v2179_v18 }
 0x1fc   : > { %v1077_v63 = vpop.permute.xlu1 %1076  ;;  %v1148_v15 = vadd.f32 %v1841_v5, %v1036_v37 }
 0x1fd   : > { %vm1099_vm0 = vcmp.eq.s32.totalorder %v1077_v63, %v2572_v59 }
 0x1fe   : > { %v1840_v20 = vsel %vm1099_vm0, 1.0, %v2179_v18 }
 0x1ff   : > { %v1147_v21 = vadd.f32 %v1840_v20, %v2974_v1 }
 0x201   : > { %1219 = vmatmul.f32.vlgmr.msra.gmra.mxu3 %v1147_v21 }
 0x202   : > { %v526_v10 = vpop.permute.xlu2 %525 }
 0x203   : > { %vm542_vm14 = vcmp.eq.s32.totalorder %v526_v10, %v2572_v59 }
 0x204   : > { %v1763_v41 = vsel %vm542_vm14, 1.0, %v2179_v18 }
 0x205   : > { %v523_v54 = vpop.permute.xlu1 %522  ;;  %v590_v27 = vadd.f32 %v1763_v41, %v478_v56 }
 0x206   : > { %vm541_vm5 = vcmp.eq.s32.totalorder %v523_v54, %v2572_v59 }
 0x207   : > { %v1762_v19 = vsel %vm541_vm5, 1.0, %v2179_v18 }
 0x208   : > { %v589_v55 = vadd.f32 %v1762_v19, %v477_v14 }
 0x209   : > { %1222 = vmatmul.f32.gmra.mxu3 %v1148_v15 }
 0x20b   : > { %v638_v48 = vpop.permute.xlu2 %637 }
 0x20c   : > { %vm654_vm15 = vcmp.eq.s32.totalorder %v638_v48, %v2572_v59 }
 0x20d   : > { %v1779_v11 = vsel %vm654_vm15, 1.0, %v2179_v18 }
 0x20e   : > { %v635_v35 = vpop.permute.xlu1 %634  ;;  %v702_v0 = vadd.f32 %v1779_v11, %v590_v27 }
 0x20f   : > { %vm653_vm6 = vcmp.eq.s32.totalorder %v635_v35, %v2572_v59 }
 0x210   : > { %v1778_v4 = vsel %vm653_vm6, 1.0, %v2179_v18 }
 0x211   : > { %v1306_v50 = vpop.f32.mrf.mxu1  ;;  %v701_v25 = vadd.f32 %v1778_v4, %v589_v55 }
 0x212   : > { %v1307_v38 = vadd.f32 %v3054_v40, %v1306_v50 }
 0x213   : > { %v813_v58 = vadd.f32 %v1794_v51, %v701_v25 }
 0x214   : > { %v1354_v33 = vmax.f32 %v1307_v38, 0.0  ;;  %v1205_v1 = vpop.f32.mrf.mxu0  ;;  %v862_v32 = vpop.permute.xlu2 %861 }
 0x215   : > { %1851 = vmatmul.msk.f32.gmra.mxu1 %vm1240_vm7, %v1205_v1  ;;  %vm878_vm1 = vcmp.eq.s32.totalorder %v862_v32, %v2572_v59 }
 0x216   : > { %1406 = vmatmul.f32.vlgmr.msra.gmra.mxu2 %v1354_v33  ;;  %v1811_v17 = vsel %vm878_vm1, 1.0, %v2179_v18 }
 0x217   : > { %v859_v3 = vpop.permute.xlu1 %858 }
 0x218   : > { %vm877_vm9 = vcmp.eq.s32.totalorder %v859_v3, %v2572_v59  ;;  %v3110_v3 = vld [vmem:[%s3314_s5] ss:$0 sm:$0xff] }
 0x219   : > { %v1309_v8 = vpop.f32.mrf.mxu1  ;;  %v1810_v43 = vsel %vm877_vm9, 1.0, %v2179_v18 }
 0x21a   : > { %v1310_v29 = vadd.f32 %v3054_v40, %v1309_v8  ;;  %v925_v52 = vadd.f32 %v1810_v43, %v813_v58 }
 0x21c   : > { %v1355_v2 = vmax.f32 %v1310_v29, 0.0  ;;  %v1208_v45 = vpop.f32.mrf.mxu0 }
 0x21d   : > { %1852 = vmatmul.msk.f32.gmra.mxu1 %vm1240_vm7, %v1208_v45  ;;  %v1086_v47 = vpop.permute.xlu2 %1085 }
 0x21e   : > { %1409 = vmatmul.f32.gmra.mxu2 %v1355_v2  ;;  %vm1102_vm2 = vcmp.eq.s32.totalorder %v1086_v47, %v2572_v59 }
 0x21f   : > { %v1843_v46 = vsel %vm1102_vm2, 1.0, %v2179_v18 }
 0x220   : > { %v971_v23 = vpop.permute.xlu1 %970 }
 0x221   : > { %vm989_vm11 = vcmp.eq.s32.totalorder %v971_v23, %v2572_v59 }
 0x222   : > { %v1826_v31 = vsel %vm989_vm11, 1.0, %v2179_v18 }
 0x223   : > { %v1037_v30 = vadd.f32 %v1826_v31, %v925_v52 }
 0x225   : > { %v1149_v44 = vadd.f32 %v1842_v7, %v1037_v30 }
 0x226   : > { %v1312_v28 = vpop.f32.mrf.mxu1 }
 0x227   : > { %v1313_v12 = vadd.f32 %v3054_v40, %v1312_v28  ;;  %1225 = vmatmul.f32.gmra.mxu3 %v1149_v44 }
 0x229   : > { %v1356_v34 = vmax.f32 %v1313_v12, 0.0  ;;  %v750_v39 = vpop.permute.xlu1 %749 }
 0x22a   : > { %vm766_vm0 = vcmp.eq.s32.totalorder %v750_v39, %v2572_v59 }
 0x22b   : > { %1412 = vmatmul.f32.gmra.mxu2 %v1356_v34  ;;  %v1795_v16 = vsel %vm766_vm0, 1.0, %v2179_v18 }
 0x22c   : > { %v814_v63 = vadd.f32 %v1795_v16, %v702_v0 }
 0x22e   : > { %v1315_v9 = vpop.f32.mrf.mxu1  ;;  %v926_v21 = vadd.f32 %v1811_v17, %v814_v63 }
 0x22f   : > { %v1316_v57 = vadd.f32 %v3054_v40, %v1315_v9 }
 0x231   : > { %v1357_v20 = vmax.f32 %v1316_v57, 0.0 }
 0x232   : > { %v974_v49 = vpop.permute.xlu1 %973 }
 0x233   : > { %vm990_vm3 = vcmp.eq.s32.totalorder %v974_v49, %v2572_v59  ;;  %1415 = vmatmul.f32.gmra.mxu2 %v1357_v20 }
 0x234   : > { %v1827_v13 = vsel %vm990_vm3, 1.0, %v2179_v18 }
 0x235   : > { %v1038_v62 = vadd.f32 %v1827_v13, %v926_v21 }
 0x237   : > { %v1150_v5 = vadd.f32 %v1843_v46, %v1038_v62 }
 0x239   : > { %1228 = vmatmul.f32.gmra.mxu3 %v1150_v5 }
 0x23a   : > { %v1211_v37 = vpop.f32.mrf.mxu0 }
 0x23b   : > { %1853 = vmatmul.msk.f32.gmra.mxu1 %vm1240_vm7, %v1211_v37 }
 0x247   : > { %v1214_v54 = vpop.f32.mrf.mxu0 }
 0x248   : > { %1854 = vmatmul.msk.f32.gmra.mxu1 %vm1240_vm7, %v1214_v54 }
 0x24c   : > { %v1318_v15 = vpop.f32.mrf.mxu1 }
 0x24d   : > { %v1319_v35 = vadd.f32 %v3054_v40, %v1318_v15 }
 0x24f   : > { %v1358_v50 = vmax.f32 %v1319_v35, 0.0 }
 0x251   : > { %1418 = vmatmul.f32.gmra.mxu2 %v1358_v50 }
 0x265   : > { %v1321_v59 = vpop.f32.mrf.mxu1 }
 0x266   : > { %v1322_v10 = vadd.f32 %v3054_v40, %v1321_v59 }
 0x268   : > { %v1359_v38 = vmax.f32 %v1322_v10, 0.0 }
 0x26a   : > { %1421 = vmatmul.f32.gmra.mxu2 %v1359_v38 }
 0x272   : > { %v1324_v18 = vpop.f32.mrf.mxu1 }
 0x273   : > { %v1325_v42 = vadd.f32 %v3054_v40, %v1324_v18 }
 0x275   : > { %v1360_v6 = vmax.f32 %v1325_v42, 0.0 }
 0x276   : > { %v1217_v22 = vpop.f32.mrf.mxu0 }
 0x277   : > { %1855 = vmatmul.msk.f32.gmra.mxu1 %vm1240_vm7, %v1217_v22  ;;  %1424 = vmatmul.f32.gmra.mxu2 %v1360_v6 }
 0x284   : > { %v1220_v33 = vpop.f32.mrf.mxu3 }
 0x285   : > { %1856 = vmatmul.msk.f32.gmra.mxu1 %vm1240_vm7, %v1220_v33 }
 0x28c   : > { %v1223_v1 = vpop.f32.mrf.mxu3 }
 0x28d   : > { %1857 = vmatmul.msk.f32.gmra.mxu1 %vm1240_vm7, %v1223_v1 }
 0x292   : > { %v1327_v61 = vpop.f32.mrf.mxu1 }
 0x293   : > { %v1328_v19 = vadd.f32 %v3054_v40, %v1327_v61 }
 0x295   : > { %v1361_v14 = vmax.f32 %v1328_v19, 0.0 }
 0x297   : > { %1427 = vmatmul.f32.gmra.mxu2 %v1361_v14 }
 0x299   : > { %v1407_v4 = vpop.f32.mrf.mxu2 }
 0x29a   : > { %v3113_v55 = vadd.f32 %v3110_v3, %v1407_v4  ;;  %v1330_v8 = vpop.f32.mrf.mxu1 }
 0x29b   : > { %v1331_v29 = vadd.f32 %v3054_v40, %v1330_v8 }
 0x29c   : > { %1455 = vmax.xlane.f32.xlu0 %v3113_v55 }
 0x29d   : > { %v1362_v25 = vmax.f32 %v1331_v29, 0.0 }
 0x29f   : > { %1430 = vmatmul.f32.gmra.mxu2 %v1362_v25 }
 0x2a1   : > { %v1410_v26 = vpop.f32.mrf.mxu2 }
 0x2a2   : > { %v3118_v48 = vadd.f32 %v3110_v3, %v1410_v26 }
 0x2a4   : > { %1457 = vmax.xlane.f32.xlu1 %v3118_v48 }
 0x2aa   : > { %v1226_v51 = vpop.f32.mrf.mxu3 }
 0x2ab   : > { %1858 = vmatmul.msk.f32.gmra.mxu1 %vm1240_vm7, %v1226_v51 }
 0x2ae   : > { %v1413_v2 = vpop.f32.mrf.mxu2 }
 0x2af   : > { %v3123_v45 = vadd.f32 %v3110_v3, %v1413_v2 }
 0x2b1   : > { %1459 = vmax.xlane.f32.xlu2 %v3123_v45 }
 0x2b6   : > { %v1416_v43 = vpop.f32.mrf.mxu2 }
 0x2b7   : > { %v3127_v58 = vadd.f32 %v3110_v3, %v1416_v43 }
 0x2b8   : > { %v1333_v23 = vpop.f32.mrf.mxu1 }
 0x2b9   : > { %v1334_v52 = vadd.f32 %v3054_v40, %v1333_v23  ;;  %1461 = vmax.xlane.f32.xlu2 %v3127_v58 }
 0x2bb   : > { %v1363_v31 = vmax.f32 %v1334_v52, 0.0 }
 0x2bc   : > { %v1229_v7 = vpop.f32.mrf.mxu3 }
 0x2bd   : > { %1859 = vmatmul.msk.f32.gmra.mxu1 %vm1240_vm7, %v1229_v7  ;;  %1433 = vmatmul.f32.gmra.mxu2 %v1363_v31 }
 0x2c5   : > { %v1336_v36 = vpop.f32.mrf.mxu1 }
 0x2c6   : > { %v1337_v53 = vadd.f32 %v3054_v40, %v1336_v36 }
 0x2c8   : > { %v1364_v30 = vmax.f32 %v1337_v53, 0.0 }
 0x2ca   : > { %1436 = vmatmul.f32.gmra.mxu2 %v1364_v30 }
 0x2d4   : > { %v1419_v32 = vpop.f32.mrf.mxu2 }
 0x2d5   : > { %v3134_v44 = vadd.f32 %v3110_v3, %v1419_v32 }
 0x2d7   : > { %1463 = vmax.xlane.f32.xlu0 %v3134_v44 }
 0x2ed   : > { %v1422_v60 = vpop.f32.mrf.mxu2 }
 0x2ee   : > { %v3138_v24 = vadd.f32 %v3110_v3, %v1422_v60 }
 0x2f0   : > { %1465 = vmax.xlane.f32.xlu1 %v3138_v24 }
 0x2f4   : > { %v1339_v28 = vpop.f32.mrf.mxu1 }
 0x2f5   : > { %v1340_v12 = vadd.f32 %v3054_v40, %v1339_v28 }
 0x2f7   : > { %v1365_v41 = vmax.f32 %v1340_v12, 0.0 }
 0x2f9   : > { %1439 = vmatmul.f32.gmra.mxu2 %v1365_v41 }
 0x2fa   : > { %v1425_v56 = vpop.f32.mrf.mxu2 }
 0x2fb   : > { %v1426_v34 = vadd.f32 %v3110_v3, %v1425_v56 }
 0x2fd   : > { %1467 = vmax.xlane.f32.xlu2 %v1426_v34 }
 0x302   : > { %v1342_v39 = vpop.f32.mrf.mxu1 }
 0x303   : > { %v1343_v11 = vadd.f32 %v3054_v40, %v1342_v39 }
 0x305   : > { %v1366_v27 = vmax.f32 %v1343_v11, 0.0 }
 0x307   : > { %1442 = vmatmul.f32.vlgmr.msrb.gmra.mxu3 %v1366_v27 }
 0x30a   : > { %v1345_v16 = vpop.f32.mrf.mxu1 }
 0x30b   : > { %v1346_v0 = vadd.f32 %v3054_v40, %v1345_v16 }
 0x30d   : > { %v1367_v9 = vmax.f32 %v1346_v0, 0.0 }
 0x30f   : > { %1445 = vmatmul.f32.gmra.mxu3 %v1367_v9  ;;  %v1456_v38 = vpop.xlane.xlu0 %1455 }
 0x310   : > { %v3166_v18 = vsub.f32 %v3113_v55, %v1456_v38 }
 0x312   : > { %v1503_v42 = vmul.f32 1.442695, %v3166_v18 }
 0x314   : > { %2039 = vpow2.f32 %v1503_v42 }
 0x317   : > { %v1458_v29 = vpop.xlane.xlu1 %1457 }
 0x318   : > { %v3181_v26 = vsub.f32 %v3118_v48, %v1458_v29 }
 0x31a   : > { %v1428_v47 = vpop.f32.mrf.mxu2  ;;  %v2040_v14 = vpop.eup %2039  ;;  %v1505_v51 = vmul.f32 1.442695, %v3181_v26 }
 0x31b   : > { %v3146_v63 = vadd.f32 %v3110_v3, %v1428_v47 }
 0x31d   : > { %1469 = vmax.xlane.f32.xlu0 %v3146_v63 }
 0x322   : > { %v1431_v57 = vpop.f32.mrf.mxu2 }
 0x323   : > { %v3150_v17 = vadd.f32 %v3110_v3, %v1431_v57 }
 0x324   : > { %v1460_v59 = vpop.xlane.xlu2 %1459 }
 0x325   : > { %1471 = vmax.xlane.f32.xlu1 %v3150_v17  ;;  %v3199_v32 = vsub.f32 %v3123_v45, %v1460_v59 }
 0x327   : > { %v1507_v12 = vmul.f32 1.442695, %v3199_v32 }
 0x328   : > { %v1348_v20 = vpop.f32.mrf.mxu1 }
 0x329   : > { %v1349_v49 = vadd.f32 %v3054_v40, %v1348_v20 }
 0x32b   : > { %v1368_v21 = vmax.f32 %v1349_v49, 0.0 }
 0x32c   : > { %v1462_v22 = vpop.xlane.xlu2 %1461 }
 0x32d   : > { %1448 = vmatmul.f32.gmra.mxu3 %v1368_v21  ;;  %v3174_v1 = vsub.f32 %v3127_v58, %v1462_v22 }
 0x32f   : > { %v1509_v61 = vmul.f32 1.442695, %v3174_v1 }
 0x331   : > { %2041 = vpow2.f32 %v1509_v61 }
 0x337   : > { %v2042_v8 = vpop.eup %2041 }
 0x33a   : > { %v1351_v13 = vpop.f32.mrf.mxu1 }
 0x33b   : > { %v1352_v46 = vadd.f32 %v3054_v40, %v1351_v13 }
 0x33d   : > { %v1369_v62 = vmax.f32 %v1352_v46, 0.0 }
 0x33f   : > { %1451 = vmatmul.f32.gmra.mxu3 %v1369_v62 }
 0x340   : > { %v1434_v5 = vpop.f32.mrf.mxu2 }
 0x341   : > { %v1435_v37 = vadd.f32 %v3110_v3, %v1434_v5 }
 0x343   : > { %1473 = vmax.xlane.f32.xlu2 %v1435_v37 }
 0x34a   : > { %v1464_v43 = vpop.xlane.xlu0 %1463 }
 0x34b   : > { %v3189_v23 = vsub.f32 %v3134_v44, %v1464_v43 }
 0x34d   : > { %v1437_v54 = vpop.f32.mrf.mxu2  ;;  %v1511_v48 = vmul.f32 1.442695, %v3189_v23 }
 0x34e   : > { %v1438_v15 = vadd.f32 %v3110_v3, %v1437_v54 }
 0x350   : > { %1475 = vmax.xlane.f32.xlu0 %v1438_v15 }
 0x363   : > { %v1466_v56 = vpop.xlane.xlu1 %1465 }
 0x364   : > { %v3210_v45 = vsub.f32 %v3138_v24, %v1466_v56 }
 0x366   : > { %v1513_v0 = vmul.f32 1.442695, %v3210_v45 }
 0x370   : > { %v1468_v19 = vpop.xlane.xlu2 %1467 }
 0x371   : > { %v3177_v4 = vsub.f32 %v1426_v34, %v1468_v19 }
 0x373   : > { %v1515_v55 = vmul.f32 1.442695, %v3177_v4 }
 0x375   : > { %2043 = vpow2.f32 %v1515_v55 }
 0x376   : > { %2045 = vpow2.f32 %v1505_v51 }
 0x37b   : > { %v2044_v25 = vpop.eup %2043 }
 0x37c   : > { %v1440_v35 = vpop.f32.mrf.mxu2  ;;  %v2046_v53 = vpop.eup %2045 }
 0x37d   : > { %v3158_v50 = vadd.f32 %v3110_v3, %v1440_v35 }
 0x37f   : > { %1477 = vmax.xlane.f32.xlu1 %v3158_v50 }
 0x38a   : > { %v1443_v10 = vpop.f32.mrf.mxu3 }
 0x38b   : > { %v3162_v40 = vadd.f32 %v3110_v3, %v1443_v10 }
 0x38d   : > { %1479 = vmax.xlane.f32.xlu2 %v3162_v40 }
 0x390   : > { %v1470_v7 = vpop.xlane.xlu0 %1469 }
 0x391   : > { %v3196_v30 = vsub.f32 %v3146_v63, %v1470_v7 }
 0x392   : > { %v1446_v6 = vpop.f32.mrf.mxu3 }
 0x393   : > { %v3170_v33 = vadd.f32 %v3110_v3, %v1446_v6  ;;  %v1517_v44 = vmul.f32 1.442695, %v3196_v30 }
 0x395   : > { %1481 = vmax.xlane.f32.xlu0 %v3170_v33 }
 0x398   : > { %v1472_v9 = vpop.xlane.xlu1 %1471 }
 0x399   : > { %v3215_v47 = vsub.f32 %v3150_v17, %v1472_v9 }
 0x39b   : > { %v1519_v57 = vmul.f32 1.442695, %v3215_v47 }
 0x39d   : > { %1535 = vadd.xlane.f32.xlu0 %v2040_v14 }
 0x3a5   : > { %1541 = vadd.xlane.f32.xlu0 %v2042_v8 }
 0x3ad   : > { %1547 = vadd.xlane.f32.xlu0 %v2044_v25 }
 0x3b0   : > { %v1449_v2 = vpop.f32.mrf.mxu3 }
 0x3b1   : > { %v3185_v58 = vadd.f32 %v3110_v3, %v1449_v2 }
 0x3b3   : > { %1483 = vmax.xlane.f32.xlu1 %v3185_v58 }
 0x3b6   : > { %v1474_v52 = vpop.xlane.xlu2 %1473 }
 0x3b7   : > { %v3191_v31 = vsub.f32 %v1435_v37, %v1474_v52 }
 0x3b9   : > { %v1521_v36 = vmul.f32 1.442695, %v3191_v31 }
 0x3bb   : > { %2047 = vpow2.f32 %v1521_v36  ;;  %1537 = vadd.xlane.f32.xlu1 %v2046_v53 }
 0x3bc   : > { %2049 = vpow2.f32 %v1511_v48 }
 0x3bd   : > { %2051 = vpow2.f32 %v1517_v44 }
 0x3be   : > { %2053 = vpow2.f32 %v1507_v12 }
 0x3c1   : > { %v2048_v60 = vpop.eup %2047 }
 0x3c2   : > { %v2050_v28 = vpop.eup %2049  ;;  %v1452_v41 = vpop.f32.mrf.mxu3  ;;  %1553 = vadd.xlane.f32.xlu0 %v2048_v60 }
 0x3c3   : > { %v3204_v34 = vadd.f32 %v3110_v3, %v1452_v41  ;;  %1543 = vadd.xlane.f32.xlu1 %v2050_v28  ;;  %v1476_v39 = vpop.xlane.xlu0 %1475  ;;  %v2052_v16 = vpop.eup %2051 }
 0x3c4   : > { %v3206_v11 = vsub.f32 %v1438_v15, %v1476_v39  ;;  %v2054_v3 = vpop.eup %2053 }
 0x3c5   : > { %1485 = vmax.xlane.f32.xlu2 %v3204_v34 }
 0x3c6   : > { %v1523_v27 = vmul.f32 1.442695, %v3206_v11 }
 0x3c8   : > { %2055 = vpow2.f32 %v1523_v27 }
 0x3c9   : > { %2057 = vpow2.f32 %v1513_v0 }
 0x3ca   : > { %2059 = vpow2.f32 %v1519_v57 }
 0x3cb   : > { %1549 = vadd.xlane.f32.xlu1 %v2052_v16 }
 0x3cd   : > { %1539 = vadd.xlane.f32.xlu2 %v2054_v3 }
 0x3ce   : > { %v2056_v63 = vpop.eup %2055 }
 0x3cf   : > { %v2058_v24 = vpop.eup %2057 }
 0x3d0   : > { %v2060_v20 = vpop.eup %2059 }
 0x3d3   : > { %1555 = vadd.xlane.f32.xlu1 %v2056_v63 }
 0x3d5   : > { %1545 = vadd.xlane.f32.xlu2 %v2058_v24 }
 0x3dd   : > { %1551 = vadd.xlane.f32.xlu2 %v2060_v20 }
 0x3f2   : > { %v1478_v49 = vpop.xlane.xlu1 %1477 }
 0x3f3   : > { %v3219_v21 = vsub.f32 %v3158_v50, %v1478_v49 }
 0x3f5   : > { %v1525_v13 = vmul.f32 1.442695, %v3219_v21 }
 0x3f7   : > { %2061 = vpow2.f32 %v1525_v13 }
 0x3fd   : > { %v2062_v46 = vpop.eup %2061 }
 0x3fe   : > { %1557 = vadd.xlane.f32.xlu2 %v2062_v46 }
 0x400   : > { %v1480_v17 = vpop.xlane.xlu2 %1479 }
 0x401   : > { %v3223_v62 = vsub.f32 %v3162_v40, %v1480_v17 }
 0x403   : > { %v1527_v5 = vmul.f32 1.442695, %v3223_v62 }
 0x405   : > { %2063 = vpow2.f32 %v1527_v5 }
 0x408   : > { %v1482_v37 = vpop.xlane.xlu0 %1481 }
 0x409   : > { %v3227_v54 = vsub.f32 %v3170_v33, %v1482_v37 }
 0x40b   : > { %v2064_v15 = vpop.eup %2063  ;;  %v1529_v35 = vmul.f32 1.442695, %v3227_v54 }
 0x40c   : > { %1559 = vadd.xlane.f32.xlu0 %v2064_v15 }
 0x40d   : > { %2065 = vpow2.f32 %v1529_v35 }
 0x410   : > { %v1536_v50 = vpop.xlane.xlu0 %1535 }
 0x411   : > { %2067 = vlog2.f32 %v1536_v50 }
 0x413   : > { %v2066_v59 = vpop.eup %2065 }
 0x414   : > { %1561 = vadd.xlane.f32.xlu1 %v2066_v59 }
 0x417   : > { %v2068_v10 = vpop.eup %2067 }
 0x418   : > { %v1568_v38 = vmul.f32 0.6931472, %v2068_v10  ;;  %v1542_v40 = vpop.xlane.xlu0 %1541 }
 0x419   : > { %2069 = vlog2.f32 %v1542_v40 }
 0x41a   : > { %v1599_v42 = vsub.f32 %v3166_v18, %v1568_v38 }
 0x41c   : > { %1615 = vst [vmem:[%s3234_s19] sm:$0xff] %v1599_v42 }
 0x41f   : > { %v2070_v6 = vpop.eup %2069 }
 0x420   : > { %v1574_v22 = vmul.f32 0.6931472, %v2070_v6  ;;  %v1548_v33 = vpop.xlane.xlu0 %1547 }
 0x421   : > { %2071 = vlog2.f32 %v1548_v33 }
 0x422   : > { %v1602_v61 = vsub.f32 %v3174_v1, %v1574_v22 }
 0x424   : > { %1618 = vst [vmem:[%s3234_s19 + $0x18] sm:$0xff] %v1602_v61 }
 0x426   : > { %v1484_v19 = vpop.xlane.xlu1 %1483 }
 0x427   : > { %v2072_v14 = vpop.eup %2071  ;;  %v3240_v55 = vsub.f32 %v3185_v58, %v1484_v19 }
 0x428   : > { %v1580_v8 = vmul.f32 0.6931472, %v2072_v14 }
 0x429   : > { %v1531_v18 = vmul.f32 1.442695, %v3240_v55 }
 0x42a   : > { %v1605_v29 = vsub.f32 %v3177_v4, %v1580_v8 }
 0x42b   : > { %2073 = vpow2.f32 %v1531_v18 }
 0x42c   : > { %1621 = vst [vmem:[%s3234_s19 + $0x30] sm:$0xff] %v1605_v29 }
 0x42e   : > { %v1538_v25 = vpop.xlane.xlu1 %1537 }
 0x42f   : > { %2075 = vlog2.f32 %v1538_v25 }
 0x431   : > { %v2074_v51 = vpop.eup %2073 }
 0x432   : > { %1563 = vadd.xlane.f32.xlu2 %v2074_v51 }
 0x435   : > { %v2076_v2 = vpop.eup %2075  ;;  %v1554_v1 = vpop.xlane.xlu0 %1553 }
 0x436   : > { %v1570_v43 = vmul.f32 0.6931472, %v2076_v2  ;;  %2077 = vlog2.f32 %v1554_v1  ;;  %v1544_v52 = vpop.xlane.xlu1 %1543 }
 0x437   : > { %2079 = vlog2.f32 %v1544_v52 }
 0x438   : > { %v1600_v58 = vsub.f32 %v3181_v26, %v1570_v43  ;;  %v1486_v48 = vpop.xlane.xlu2 %1485 }
 0x439   : > { %v3247_v4 = vsub.f32 %v3204_v34, %v1486_v48 }
 0x43a   : > { %1616 = vst [vmem:[%s3234_s19 + $0x8] sm:$0xff] %v1600_v58 }
 0x43b   : > { %v1533_v7 = vmul.f32 1.442695, %v3247_v4 }
 0x43c   : > { %v2078_v36 = vpop.eup %2077 }
 0x43d   : > { %v2080_v53 = vpop.eup %2079  ;;  %v1586_v44 = vmul.f32 0.6931472, %v2078_v36  ;;  %2081 = vpow2.f32 %v1533_v7 }
 0x43e   : > { %v1576_v60 = vmul.f32 0.6931472, %v2080_v53  ;;  %v1550_v28 = vpop.xlane.xlu1 %1549 }
 0x43f   : > { %v1608_v12 = vsub.f32 %v3191_v31, %v1586_v44  ;;  %2083 = vlog2.f32 %v1550_v28 }
 0x440   : > { %v1603_v41 = vsub.f32 %v3189_v23, %v1576_v60  ;;  %v1540_v26 = vpop.xlane.xlu2 %1539 }
 0x441   : > { %1624 = vst [vmem:[%s3234_s19 + $0x48] sm:$0xff] %v1608_v12  ;;  %2085 = vlog2.f32 %v1540_v26 }
 0x442   : > { %1619 = vst [vmem:[%s3234_s19 + $0x20] sm:$0xff] %v1603_v41 }
 0x443   : > { %v2082_v56 = vpop.eup %2081 }
 0x444   : > { %1565 = vadd.xlane.f32.xlu0 %v2082_v56 }
 0x445   : > { %v2084_v34 = vpop.eup %2083 }
 0x446   : > { %v1582_v39 = vmul.f32 0.6931472, %v2084_v34  ;;  %v1556_v27 = vpop.xlane.xlu1 %1555 }
 0x447   : > { %v2086_v16 = vpop.eup %2085  ;;  %2087 = vlog2.f32 %v1556_v27 }
 0x448   : > { %v1606_v0 = vsub.f32 %v3196_v30, %v1582_v39  ;;  %v1572_v31 = vmul.f32 0.6931472, %v2086_v16  ;;  %v1546_v9 = vpop.xlane.xlu2 %1545 }
 0x449   : > { %2089 = vlog2.f32 %v1546_v9 }
 0x44a   : > { %1622 = vst [vmem:[%s3234_s19 + $0x38] sm:$0xff] %v1606_v0  ;;  %v1601_v23 = vsub.f32 %v3199_v32, %v1572_v31 }
 0x44c   : > { %1617 = vst [vmem:[%s3234_s19 + $0x10] sm:$0xff] %v1601_v23 }
 0x44d   : > { %v2088_v3 = vpop.eup %2087 }
 0x44e   : > { %v1588_v63 = vmul.f32 0.6931472, %v2088_v3 }
 0x44f   : > { %v2090_v57 = vpop.eup %2089 }
 0x450   : > { %v1609_v24 = vsub.f32 %v3206_v11, %v1588_v63  ;;  %v1578_v20 = vmul.f32 0.6931472, %v2090_v57  ;;  %v1552_v49 = vpop.xlane.xlu2 %1551 }
 0x451   : > { %2091 = vlog2.f32 %v1552_v49 }
 0x452   : > { %1625 = vst [vmem:[%s3234_s19 + $0x50] sm:$0xff] %v1609_v24  ;;  %v1604_v30 = vsub.f32 %v3210_v45, %v1578_v20 }
 0x454   : > { %1620 = vst [vmem:[%s3234_s19 + $0x28] sm:$0xff] %v1604_v30 }
 0x457   : > { %v2092_v13 = vpop.eup %2091 }
 0x458   : > { %v1584_v46 = vmul.f32 0.6931472, %v2092_v13 }
 0x45a   : > { %v1607_v17 = vsub.f32 %v3215_v47, %v1584_v46 }
 0x45c   : > { %1623 = vst [vmem:[%s3234_s19 + $0x40] sm:$0xff] %v1607_v17 }
 0x471   : > { %v1558_v32 = vpop.xlane.xlu2 %1557 }
 0x472   : > { %2093 = vlog2.f32 %v1558_v32 }
 0x478   : > { %v2094_v5 = vpop.eup %2093 }
 0x479   : > { %v1590_v37 = vmul.f32 0.6931472, %v2094_v5 }
 0x47b   : > { %v1610_v11 = vsub.f32 %v3219_v21, %v1590_v37 }
 0x47d   : > { %1626 = vst [vmem:[%s3234_s19 + $0x58] sm:$0xff] %v1610_v11 }
 0x47f   : > { %v1560_v15 = vpop.xlane.xlu0 %1559 }
 0x480   : > { %2095 = vlog2.f32 %v1560_v15 }
 0x486   : > { %v2096_v35 = vpop.eup %2095 }
 0x487   : > { %v1592_v45 = vmul.f32 0.6931472, %v2096_v35  ;;  %v1562_v50 = vpop.xlane.xlu1 %1561 }
 0x488   : > { %2097 = vlog2.f32 %v1562_v50 }
 0x489   : > { %v1611_v59 = vsub.f32 %v3223_v62, %v1592_v45 }
 0x48b   : > { %1627 = vst [vmem:[%s3234_s19 + $0x60] sm:$0xff] %v1611_v59 }
 0x48e   : > { %v2098_v47 = vpop.eup %2097 }
 0x48f   : > { %v1594_v10 = vmul.f32 0.6931472, %v2098_v47 }
 0x491   : > { %v1612_v38 = vsub.f32 %v3227_v54, %v1594_v10 }
 0x493   : > { %1628 = vst [vmem:[%s3234_s19 + $0x68] sm:$0xff] %v1612_v38 }
 0x4a5   : > { %v1564_v40 = vpop.xlane.xlu2 %1563 }
 0x4a6   : > { %2099 = vlog2.f32 %v1564_v40 }
 0x4ac   : > { %v2100_v21 = vpop.eup %2099 }
 0x4ad   : > { %v1596_v42 = vmul.f32 0.6931472, %v2100_v21 }
 0x4af   : > { %v1613_v6 = vsub.f32 %v3240_v55, %v1596_v42 }
 0x4b1   : > { %1629 = vst [vmem:[%s3234_s19 + $0x70] sm:$0xff] %v1613_v6 }
 0x4b7   : > { %v1566_v22 = vpop.xlane.xlu0 %1565 }
 0x4b8   : > { %2101 = vlog2.f32 %v1566_v22 }
 0x4be   : > { %v2102_v62 = vpop.eup %2101 }
 0x4bf   : > { %v1598_v54 = vmul.f32 0.6931472, %v2102_v62 }
 0x4c1   : > { %v1614_v33 = vsub.f32 %v3247_v4, %v1598_v54 }
 0x4c3   : > { %1630 = vst [vmem:[%s3234_s19 + $0x78] sm:$0xff] %v1614_v33 }
 0x4c4   : > { %2134 = shalt.err (!%p2131_p3)
}
 0x4c5   : > { %s2180_s17 = smov 128   ;;  %s2181_s19 = smov 8  }
 0x4c6   : > { %1898 = dma.vmem_to_hbm [thread:$0]  (%p2255_p5), %s1645_s9, 2048, %s1647_s10, %s1632_s13, %s2180_s17, %s2180_s17, %s2181_s19  }
 0x4c7 PF: > { %p1904_p4 = scmp.ge.s32.totalorder %s2169_s24, 2  ;;  %s1661_s20 = sand.u32 1, %s2157_s21  }
 0x4c8   : > { %s1662_s26 = scalar_lea.sflag [#allocation3], %s1661_s20 }
 0x4c9   : > { %p1901_p7 = pnand %p1904_p4, %p2259_p6 }
 0x4cb   : > { %p1902_p8 = pneg %p1901_p7 }
 0x4cd   : > { %2152 = dma.done.wait (%p1902_p8), %s1662_s26, 2048  }
 0x4ce   : > { %2154 = vsyncadd (%p1902_p8), %s1662_s26, 4294965248  ;;  %p16_p9 = scmp.ge.s32.totalorder %s2242_s27, 4   ;;  %s3342_s21 = smov %s2161_s22 }
 0x4cf   : > { %s3343_s22 = smov %s2165_s23  ;;  %s3344_s23 = smov %s2253_s30 }
 0x4d0   : > { %s3345_s24 = smov %s2242_s27  ;;  %18 = sbr.rel (!%p16_p9) target bundleno = 3 (0x3), region = 79 }
 0x4d5   :  { %1668 = vsyncpa [#allocation3], 1 }
 0x4d6   :  { %1670 = vsyncpa [#allocation3 + $0x1], 1 }

</bundles_post_ra>
